<compile_context>
chip_gen: v7x
topology: tpu7x:2x2x1
jax: 0.10.0
libtpu: 0.0.40
codegen_flags: <defaults>
</compile_context>

<pallas_src>
import jax
import jax.numpy as jnp
from jax.experimental import pallas as pl
from jax.experimental.pallas import tpu as pltpu


# ----- synthetic "net" configuration (the attributes StandardModel reads) -----
INPUT_SIZE = (3, 16, 16)          # (C, H, W)
INPUT_SPACE = "RGB"               # 'RGB' or 'BGR'
INPUT_RANGE = (0.0, 1.0)          # max == 255 would trigger x * 255
MEAN = (0.485, 0.456, 0.406)
STD = (0.229, 0.224, 0.225)
NUM_CLASSES = 10
NUM_CLASSES_PAD = 128             # lane-dense logit output; sliced to 10 outside

C, H, W = INPUT_SIZE
HW = H * W
D = C * HW                        # flattened feature dim = 768

MAX_ROW_TILE = 128                # row-grid tile (>=8, <=128)


def _round_up(x, m):
    return ((x + m - 1) // m) * m


# ------------------------------ fused kernels -------------------------------
def _kernel_pair(adv_ref, img_ref, wcls_ref, bcls_ref, wgrad_ref, bgrad_ref,
                 adv_logit_ref, img_logit_ref, grad_ref):
    # Whiten (affine part) is folded into the weights; only clamp remains.
    # Clip in f32, cast once to bf16 for the MXU operands, accumulate f32.
    wcls = wcls_ref[...]                                            # bf16
    bcls = bcls_ref[...]                                            # f32
    adv = jnp.clip(adv_ref[...], 0.0, 1.0).astype(jnp.bfloat16)     # (tm, D)
    adv_logit_ref[...] = (
        jnp.dot(adv, wcls, preferred_element_type=jnp.float32) + bcls)
    grad_ref[...] = jnp.tanh(
        jnp.dot(adv, wgrad_ref[...], preferred_element_type=jnp.float32)
        + bgrad_ref[...])
    img = jnp.clip(img_ref[...], 0.0, 1.0).astype(jnp.bfloat16)     # (tm, D)
    img_logit_ref[...] = (
        jnp.dot(img, wcls, preferred_element_type=jnp.float32) + bcls)


def _kernel_single(adv_ref, wcls_ref, bcls_ref, wgrad_ref, bgrad_ref,
                   adv_logit_ref, grad_ref):
    adv = jnp.clip(adv_ref[...], 0.0, 1.0).astype(jnp.bfloat16)     # (tm, D)
    adv_logit_ref[...] = (
        jnp.dot(adv, wcls_ref[...], preferred_element_type=jnp.float32)
        + bcls_ref[...])
    grad_ref[...] = jnp.tanh(
        jnp.dot(adv, wgrad_ref[...], preferred_element_type=jnp.float32)
        + bgrad_ref[...])


def _policy_call(adv_pad, img_pad, tm, kp):
    """adv_pad/img_pad: (m_pad, D) f32 raw pixels (rows zero-padded).

    Returns padded logits (and image logits if img_pad is not None) plus the
    padded flat grad; real rows are sliced in the wrapper.
    """
    m_pad = adv_pad.shape[0]
    grid = (m_pad // tm,)

    row_spec = pl.BlockSpec((tm, D), lambda i: (i, 0))
    logit_spec = pl.BlockSpec((tm, NUM_CLASSES_PAD), lambda i: (i, 0))
    # Constant block index => weights are DMA'd once and stay VMEM-resident
    # across the whole row grid.
    wcls_spec = pl.BlockSpec((D, NUM_CLASSES_PAD), lambda i: (0, 0))
    bcls_spec = pl.BlockSpec((1, NUM_CLASSES_PAD), lambda i: (0, 0))
    wgrad_spec = pl.BlockSpec((D, D), lambda i: (0, 0))
    bgrad_spec = pl.BlockSpec((1, D), lambda i: (0, 0))
    cparams = pltpu.CompilerParams(dimension_semantics=("parallel",))

    # TODO(synk): if this head is scaled to a real policy net (large D), add a
    # K-contraction grid + f32 accumulator scratch instead of a full-VMEM
    # w_grad; size tk/tn for v7x's 64 MiB physical / 32 MiB scoped-default VMEM
    # (set vmem_limit_bytes explicitly).  fp8 w_grad is a further option on
    # v7x only (v5e/v6e MXUs take bf16/int8, not fp8).
    if img_pad is None:
        return pl.pallas_call(
            _kernel_single,
            out_shape=(
                jax.ShapeDtypeStruct((m_pad, NUM_CLASSES_PAD), jnp.float32),
                jax.ShapeDtypeStruct((m_pad, D), jnp.float32),
            ),
            grid=grid,
            in_specs=[row_spec, wcls_spec, bcls_spec, wgrad_spec, bgrad_spec],
            out_specs=(logit_spec, row_spec),
            compiler_params=cparams,
        )(adv_pad, kp["w_cls"], kp["b_cls"], kp["w_grad"], kp["b_grad"])

    return pl.pallas_call(
        _kernel_pair,
        out_shape=(
            jax.ShapeDtypeStruct((m_pad, NUM_CLASSES_PAD), jnp.float32),
            jax.ShapeDtypeStruct((m_pad, NUM_CLASSES_PAD), jnp.float32),
            jax.ShapeDtypeStruct((m_pad, D), jnp.float32),
        ),
        grid=grid,
        in_specs=[row_spec, row_spec, wcls_spec, bcls_spec, wgrad_spec,
                  bgrad_spec],
        out_specs=(logit_spec, logit_spec, row_spec),
        compiler_params=cparams,
    )(adv_pad, img_pad, kp["w_cls"], kp["b_cls"], kp["w_grad"], kp["b_grad"])


def _pad_rows(x, m_pad):
    if x.shape[0] == m_pad:
        return x
    return jnp.zeros((m_pad, x.shape[1]), x.dtype).at[: x.shape[0]].set(x)


# --------------------------- module-level wrapper ---------------------------
class StandardPolicyModel:
    """JAX/Pallas port of StandardPolicyModel wrapping a synthetic policy net."""

    def __init__(self):
        self.input_space = INPUT_SPACE
        self.input_range = INPUT_RANGE
        self.input_size = INPUT_SIZE
        self.mean = jnp.asarray(MEAN, jnp.float32).reshape(1, -1, 1, 1)
        self.std = jnp.asarray(STD, jnp.float32).reshape(1, -1, 1, 1)

        # Deterministic synthetic parameters (the real `net` is an external
        # architecture; this stands in for it).
        kw = jax.random.PRNGKey(42)
        k1, k2 = jax.random.split(kw)
        self.params = {
            "w_cls": jax.random.normal(k1, (D, NUM_CLASSES), jnp.float32) * 0.02,
            "b_cls": jnp.zeros((1, NUM_CLASSES), jnp.float32),
            "w_grad": jax.random.normal(k2, (D, D), jnp.float32) * 0.02,
            "b_grad": jnp.zeros((1, D), jnp.float32),
            "log_std": jnp.full((1, D), -1.0, jnp.float32),
        }
        self.init_params = jax.tree_util.tree_map(lambda x: x, self.params)
        self.factor = 1.0
        self._prepare_kernel_params()

    # ---- derived, kernel-ready parameters (whiten fold + padding + bf16) ----
    def _prepare_kernel_params(self):
        p = self.params
        # Fold the BGR input-channel permutation into the whiten constants and
        # the weight rows (identity permutation for RGB), then fold the whiten
        # affine into the weights/biases:
        #   (clip(x) * scale + bias) @ W + b == clip(x) @ (scale*W) + (bias@W + b)
        if self.input_space == "BGR":
            perm = jnp.asarray([2, 1, 0], jnp.int32)
        else:
            perm = jnp.asarray([0, 1, 2], jnp.int32)

        mean = self.mean.reshape(C)[perm]
        std = self.std.reshape(C)[perm]
        range_mul = 255.0 if max(self.input_range) == 255 else 1.0
        scale = jnp.repeat(range_mul / std, HW).reshape(D, 1)   # per input feature
        bias_vec = jnp.repeat(-mean / std, HW).reshape(1, D)

        def fold(wmat, bvec):
            w = wmat.reshape(C, HW, -1)[perm].reshape(D, -1)    # channel reorder
            w_folded = w * scale                                # (D, out) f32
            b_folded = bvec + bias_vec @ w                      # (1, out) f32
            return w_folded, b_folded

        w_cls, b_cls = fold(p["w_cls"], p["b_cls"])
        w_cls_pad = jnp.zeros((D, NUM_CLASSES_PAD), jnp.float32)
        w_cls_pad = w_cls_pad.at[:, :NUM_CLASSES].set(w_cls)
        b_cls_pad = jnp.zeros((1, NUM_CLASSES_PAD), jnp.float32)
        b_cls_pad = b_cls_pad.at[:, :NUM_CLASSES].set(b_cls)

        w_grad, b_grad = fold(p["w_grad"], p["b_grad"])

        self._kernel_params = {
            "w_cls": w_cls_pad.astype(jnp.bfloat16),   # bf16 MXU operand
            "b_cls": b_cls_pad,                        # f32 bias add
            "w_grad": w_grad.astype(jnp.bfloat16),     # bf16 MXU operand
            "b_grad": b_grad,                          # f32 bias add
        }

    # ---- API-parity whiten (forward uses the folded in-kernel version) ----
    def whiten(self, x):
        if self.input_space == "BGR":
            x = x[:, jnp.array([2, 1, 0]), :, :]
        x = jnp.clip(x, 0.0, 1.0)
        if max(self.input_range) == 255:
            x = x * 255.0
        return (x - self.mean) / self.std

    def forward(self, adv_image, image=None, label=None, target=None,
                output_fields=("grad", "std", "adv_logit", "logit")):
        # TODO(synk): label/target accepted for API parity; the original policy
        # net's loss-conditioned branches are architecture-specific.
        n = adv_image.shape[0]
        adv_flat = adv_image.reshape(n, D).astype(jnp.float32)

        n_img = image.shape[0] if image is not None else 0

        # Pad rows to a multiple of the tile so all stores are full-sublane and
        # one row grid covers both operands; slice real rows back outside.
        m_pad = _round_up(max(n, n_img, 1), 8)
        tm = min(MAX_ROW_TILE, m_pad)
        m_pad = _round_up(m_pad, tm)
        adv_pad = _pad_rows(adv_flat, m_pad)

        if image is None:
            adv_logits, grad_pad = _policy_call(adv_pad, None, tm,
                                                self._kernel_params)
            adv_logit = adv_logits[:n, :NUM_CLASSES]
            logit = adv_logit                           # reuse; no second matmul
        else:
            img_flat = image.reshape(n_img, D).astype(jnp.float32)
            img_pad = _pad_rows(img_flat, m_pad)
            adv_logits, img_logits, grad_pad = _policy_call(
                adv_pad, img_pad, tm, self._kernel_params)
            adv_logit = adv_logits[:n, :NUM_CLASSES]
            logit = img_logits[:n_img, :NUM_CLASSES]

        # std depends only on parameters; output['std'] / factor fused here.
        std_row = jnp.exp(self.params["log_std"]) / self.factor      # (1, D)
        std = jnp.broadcast_to(std_row, (n, D)).reshape(n, C, H, W)

        output = {
            "grad": grad_pad[:n].reshape(n, C, H, W),
            "std": std,
            "adv_logit": adv_logit,
            "logit": logit,
        }
        return {k: output[k] for k in output_fields if k in output}

    def reinit(self):
        self.params = jax.tree_util.tree_map(lambda x: x, self.init_params)
        self.factor = 1.0
        self._prepare_kernel_params()

    def rescale(self, scale):
        self.factor *= scale


# ----------------------------------- main -----------------------------------
if __name__ == "__main__":
    key = jax.random.PRNGKey(0)
    k1, k2 = jax.random.split(key)
    adv_image = jax.random.uniform(k1, (2, C, H, W), dtype=jnp.float32)
    image = jax.random.uniform(k2, (2, C, H, W), dtype=jnp.float32)

    model = StandardPolicyModel()
    model.rescale(2.0)   # exercise the std / factor path

    out = jax.block_until_ready(model.forward(adv_image, image))

    assert out["grad"].shape == (2, C, H, W)
    assert out["std"].shape == (2, C, H, W)
    assert out["adv_logit"].shape == (2, NUM_CLASSES)
    assert out["logit"].shape == (2, NUM_CLASSES)
    assert bool(jnp.all(jnp.isfinite(out["grad"])))
    assert bool(jnp.all(jnp.isfinite(out["adv_logit"])))
    assert bool(jnp.all(jnp.isfinite(out["logit"])))

    # Pure-JAX f32 reference (whiten -> heads); bf16 MXU operands in the kernel
    # give ~1e-2 relative deviation, so tolerances are loose by design.
    feat_adv = model.whiten(adv_image).reshape(2, D)
    feat_img = model.whiten(image).reshape(2, D)
    ref_adv_logit = feat_adv @ model.params["w_cls"] + model.params["b_cls"]
    ref_logit = feat_img @ model.params["w_cls"] + model.params["b_cls"]
    ref_grad = jnp.tanh(feat_adv @ model.params["w_grad"]
                        + model.params["b_grad"]).reshape(2, C, H, W)
    ref_std = (jnp.exp(model.params["log_std"]) / model.factor)
    ref_std = jnp.broadcast_to(ref_std, (2, D)).reshape(2, C, H, W)
    assert bool(jnp.allclose(out["adv_logit"], ref_adv_logit, atol=8e-2, rtol=5e-2))
    assert bool(jnp.allclose(out["logit"], ref_logit, atol=8e-2, rtol=5e-2))
    assert bool(jnp.allclose(out["grad"], ref_grad, atol=8e-2, rtol=5e-2))
    assert bool(jnp.allclose(out["std"], ref_std))

    # image-is-None fast path: single whiten+matmul, logit reuses adv_logit.
    out2 = jax.block_until_ready(model.forward(adv_image))
    assert out2["grad"].shape == (2, C, H, W)
    assert bool(jnp.allclose(out2["logit"], out2["adv_logit"]))
    assert bool(jnp.allclose(out2["adv_logit"], ref_adv_logit, atol=8e-2, rtol=5e-2))

    print("KERNEL_OK")
</pallas_src>

<mosaic_0001>
module attributes {stable_mosaic.version = 11 : i64} {
  func.func @_kernel_pair(%arg0: i32, %arg1: memref<8x768xf32, #tpu.memory_space<vmem>>, %arg2: memref<8x768xf32, #tpu.memory_space<vmem>>, %arg3: memref<768x128xbf16, #tpu.memory_space<vmem>>, %arg4: memref<1x128xf32, #tpu.memory_space<vmem>>, %arg5: memref<768x768xbf16, #tpu.memory_space<vmem>>, %arg6: memref<1x768xf32, #tpu.memory_space<vmem>>, %arg7: memref<8x128xf32, #tpu.memory_space<vmem>>, %arg8: memref<8x128xf32, #tpu.memory_space<vmem>>, %arg9: memref<8x768xf32, #tpu.memory_space<vmem>>) attributes {dimension_semantics = [#tpu.dimension_semantics<parallel>], iteration_bounds = array<i64: 1>, scalar_prefetch = 0 : i64, scratch_operands = 0 : i64, tpu.core_type = #tpu.core_type<tc>, window_params = [{transform_indices = @transform_0, window_bounds = array<i64: 8, 768>}, {transform_indices = @transform_1, window_bounds = array<i64: 8, 768>}, {pipeline_mode = #tpu.pipeline_mode<synchronous>, transform_indices = @transform_2, window_bounds = array<i64: 768, 128>}, {pipeline_mode = #tpu.pipeline_mode<synchronous>, transform_indices = @transform_3, window_bounds = array<i64: 1, 128>}, {pipeline_mode = #tpu.pipeline_mode<synchronous>, transform_indices = @transform_4, window_bounds = array<i64: 768, 768>}, {pipeline_mode = #tpu.pipeline_mode<synchronous>, transform_indices = @transform_5, window_bounds = array<i64: 1, 768>}, {transform_indices = @transform_6, window_bounds = array<i64: 8, 128>}, {transform_indices = @transform_7, window_bounds = array<i64: 8, 128>}, {transform_indices = @transform_8, window_bounds = array<i64: 8, 768>}]} {
    %c0 = arith.constant 0 : index
    %c0_0 = arith.constant 0 : index
    %0 = vector.load %arg3[%c0, %c0_0] : memref<768x128xbf16, #tpu.memory_space<vmem>>, vector<768x128xbf16>
    %c0_1 = arith.constant 0 : index
    %c0_2 = arith.constant 0 : index
    %1 = vector.load %arg4[%c0_1, %c0_2] : memref<1x128xf32, #tpu.memory_space<vmem>>, vector<1x128xf32>
    %c0_3 = arith.constant 0 : index
    %c0_4 = arith.constant 0 : index
    %2 = vector.load %arg1[%c0_3, %c0_4] : memref<8x768xf32, #tpu.memory_space<vmem>>, vector<8x768xf32>
    %cst = arith.constant 0.000000e+00 : f32
    %cst_5 = arith.constant 1.000000e+00 : f32
    %3 = vector.broadcast %cst : f32 to vector<8x768xf32>
    %4 = arith.maximumf %3, %2 : vector<8x768xf32>
    %5 = vector.broadcast %cst_5 : f32 to vector<8x768xf32>
    %6 = arith.minimumf %5, %4 : vector<8x768xf32>
    %7 = arith.truncf %6 : vector<8x768xf32> to vector<8x768xbf16>
    %cst_6 = arith.constant dense<0.000000e+00> : vector<8x128xf32>
    %8 = tpu.matmul %7, %0, %cst_6 {dimension_numbers = #tpu.dot_dimension_numbers<[1], [0], [0], [1], [0, 0, 1, 1], [], []>} : vector<8x768xbf16>, vector<768x128xbf16>, vector<8x128xf32> -> vector<8x128xf32>
    %9 = vector.broadcast %1 : vector<1x128xf32> to vector<8x128xf32>
    %10 = arith.addf %8, %9 : vector<8x128xf32>
    %c0_7 = arith.constant 0 : index
    %c0_8 = arith.constant 0 : index
    %11 = vector.load %arg7[%c0_7, %c0_8] : memref<8x128xf32, #tpu.memory_space<vmem>>, vector<8x128xf32>
    tpu.vector_store %arg7[%c0_7, %c0_8], %10 {strides = array<i32>} : memref<8x128xf32, #tpu.memory_space<vmem>>, vector<8x128xf32>,
    %c0_9 = arith.constant 0 : index
    %c0_10 = arith.constant 0 : index
    %12 = vector.load %arg5[%c0_9, %c0_10] : memref<768x768xbf16, #tpu.memory_space<vmem>>, vector<768x768xbf16>
    %cst_11 = arith.constant dense<0.000000e+00> : vector<8x768xf32>
    %13 = tpu.matmul %7, %12, %cst_11 {dimension_numbers = #tpu.dot_dimension_numbers<[1], [0], [0], [1], [0, 0, 1, 1], [], []>} : vector<8x768xbf16>, vector<768x768xbf16>, vector<8x768xf32> -> vector<8x768xf32>
    %c0_12 = arith.constant 0 : index
    %c0_13 = arith.constant 0 : index
    %14 = vector.load %arg6[%c0_12, %c0_13] : memref<1x768xf32, #tpu.memory_space<vmem>>, vector<1x768xf32>
    %15 = vector.broadcast %14 : vector<1x768xf32> to vector<8x768xf32>
    %16 = arith.addf %13, %15 : vector<8x768xf32>
    %17 = math.tanh %16 : vector<8x768xf32>
    %c0_14 = arith.constant 0 : index
    %c0_15 = arith.constant 0 : index
    %18 = vector.load %arg9[%c0_14, %c0_15] : memref<8x768xf32, #tpu.memory_space<vmem>>, vector<8x768xf32>
    tpu.vector_store %arg9[%c0_14, %c0_15], %17 {strides = array<i32>} : memref<8x768xf32, #tpu.memory_space<vmem>>, vector<8x768xf32>,
    %c0_16 = arith.constant 0 : index
    %c0_17 = arith.constant 0 : index
    %19 = vector.load %arg2[%c0_16, %c0_17] : memref<8x768xf32, #tpu.memory_space<vmem>>, vector<8x768xf32>
    %cst_18 = arith.constant 0.000000e+00 : f32
    %cst_19 = arith.constant 1.000000e+00 : f32
    %20 = vector.broadcast %cst_18 : f32 to vector<8x768xf32>
    %21 = arith.maximumf %20, %19 : vector<8x768xf32>
    %22 = vector.broadcast %cst_19 : f32 to vector<8x768xf32>
    %23 = arith.minimumf %22, %21 : vector<8x768xf32>
    %24 = arith.truncf %23 : vector<8x768xf32> to vector<8x768xbf16>
    %cst_20 = arith.constant dense<0.000000e+00> : vector<8x128xf32>
    %25 = tpu.matmul %24, %0, %cst_20 {dimension_numbers = #tpu.dot_dimension_numbers<[1], [0], [0], [1], [0, 0, 1, 1], [], []>} : vector<8x768xbf16>, vector<768x128xbf16>, vector<8x128xf32> -> vector<8x128xf32>
    %26 = vector.broadcast %1 : vector<1x128xf32> to vector<8x128xf32>
    %27 = arith.addf %25, %26 : vector<8x128xf32>
    %c0_21 = arith.constant 0 : index
    %c0_22 = arith.constant 0 : index
    %28 = vector.load %arg8[%c0_21, %c0_22] : memref<8x128xf32, #tpu.memory_space<vmem>>, vector<8x128xf32>
    tpu.vector_store %arg8[%c0_21, %c0_22], %27 {strides = array<i32>} : memref<8x128xf32, #tpu.memory_space<vmem>>, vector<8x128xf32>,
    return
  }
  func.func @transform_0(%arg0: i32) -> (i32, i32) {
    %c0_i32 = arith.constant 0 : i32
    %c0_i32_0 = arith.constant 0 : i32
    return %arg0, %c0_i32 : i32, i32
  }
  func.func @transform_1(%arg0: i32) -> (i32, i32) {
    %c0_i32 = arith.constant 0 : i32
    %c0_i32_0 = arith.constant 0 : i32
    return %arg0, %c0_i32 : i32, i32
  }
  func.func @transform_2(%arg0: i32) -> (i32, i32) {
    %c0_i32 = arith.constant 0 : i32
    %c0_i32_0 = arith.constant 0 : i32
    %c0_i32_1 = arith.constant 0 : i32
    return %c0_i32, %c0_i32_0 : i32, i32
  }
  func.func @transform_3(%arg0: i32) -> (i32, i32) {
    %c0_i32 = arith.constant 0 : i32
    %c0_i32_0 = arith.constant 0 : i32
    %c0_i32_1 = arith.constant 0 : i32
    return %c0_i32, %c0_i32_0 : i32, i32
  }
  func.func @transform_4(%arg0: i32) -> (i32, i32) {
    %c0_i32 = arith.constant 0 : i32
    %c0_i32_0 = arith.constant 0 : i32
    %c0_i32_1 = arith.constant 0 : i32
    return %c0_i32, %c0_i32_0 : i32, i32
  }
  func.func @transform_5(%arg0: i32) -> (i32, i32) {
    %c0_i32 = arith.constant 0 : i32
    %c0_i32_0 = arith.constant 0 : i32
    %c0_i32_1 = arith.constant 0 : i32
    return %c0_i32, %c0_i32_0 : i32, i32
  }
  func.func @transform_6(%arg0: i32) -> (i32, i32) {
    %c0_i32 = arith.constant 0 : i32
    %c0_i32_0 = arith.constant 0 : i32
    return %arg0, %c0_i32 : i32, i32
  }
  func.func @transform_7(%arg0: i32) -> (i32, i32) {
    %c0_i32 = arith.constant 0 : i32
    %c0_i32_0 = arith.constant 0 : i32
    return %arg0, %c0_i32 : i32, i32
  }
  func.func @transform_8(%arg0: i32) -> (i32, i32) {
    %c0_i32 = arith.constant 0 : i32
    %c0_i32_0 = arith.constant 0 : i32
    return %arg0, %c0_i32 : i32, i32
  }
}

</mosaic_0001>

<bundles_post_ra>
// kernel: tpu_custom_call.1
= control target key start
LH: loop header
LB: loop body
LE: loop exit
PB: predicated region body
PF: predicated region fallthrough
CT: control target
= control target key end

     0   :  { %14 = vsyncpa [#allocation3], 0  ;;  %s4467_s0 = inlined_call_operand.hbm [shape: f32[8,768], index: 0, kind: input, shape index: {}]   ;;  %s4468_s1 = inlined_call_operand.hbm [shape: f32[8,768], index: 1, kind: input, shape index: {}]   ;;  %s4469_s2 = inlined_call_operand.hbm [shape: bf16[768,128], index: 2, kind: input, shape index: {}]   ;;  %s4470_s3 = inlined_call_operand.hbm [shape: f32[1,128], index: 3, kind: input, shape index: {}]   ;;  %s4471_s4 = inlined_call_operand.hbm [shape: bf16[768,768], index: 4, kind: input, shape index: {}]   ;;  %s4472_s5 = inlined_call_operand.hbm [shape: f32[1,768], index: 5, kind: input, shape index: {}]   ;;  %s4473_s6 = inlined_call_operand.hbm [shape: f32[8,128], index: 6, kind: output, shape index: {0}]   ;;  %s4474_s7 = inlined_call_operand.hbm [shape: f32[8,128], index: 7, kind: output, shape index: {1}]   ;;  %s4475_s8 = inlined_call_operand.hbm [shape: f32[8,768], index: 8, kind: output, shape index: {2}]  }
   0x1   :  { %15 = vsyncpa [#allocation6], 0 }
   0x2   :  { %16 = vsyncpa [#allocation9], 0 }
   0x3   :  { %17 = vsyncpa [#allocation12], 0 }
   0x4   :  { %18 = vsyncpa [#allocation4], 0 }
   0x5   :  { %19 = vsyncpa [#allocation15], 0  ;;  %s4232_s27 = smov [#allocation5]   ;;  %s4233_s29 = smov [#allocation8]  }
   0x6   :  { %s36_s28 = sshll.u32 %s4232_s27, 4  ;;  %s58_s30 = sshll.u32 %s4233_s29, 4  ;;  %s37_s28 = int_to_ptr.vmem [resolvable:$true] %s36_s28  ;;  %s59_s30 = int_to_ptr.vmem [resolvable:$true] %s58_s30 }
   0x7   :  { %s4022_s11 = scalar_lea.hbm %s4468_s1, 768 }
   0x8   :  { %p4023_p0 = scmp.ne.s32.totalorder %s4468_s1, %s4022_s11  ;;  %p4026_p1 = scmp.lt.u32.totalorder %s4022_s11, %s4468_s1 }
   0xa   :  { %p4028_p2 = pnand %p4026_p1, %p4023_p0 }
   0xc   :  { %4031 = shalt.err (!%p4028_p2)
}
   0xd   :  { %s4032_s16 = scalar_lea.vmem %s37_s28, 768  ;;  %p4037_p4 = scmp.lt.s32.totalorder %s37_s28, %s37_s28 }
   0xe   :  { %p4033_p3 = scmp.ne.s32.totalorder %s37_s28, %s4032_s16  ;;  %p4038_p5 = scmp.lt.s32.totalorder %s4032_s16, %s4032_s16 }
  0x10   :  { %p4039_p6 = por %p4038_p5, %p4037_p4 }
  0x12   :  { %p4040_p7 = pnand %p4039_p6, %p4033_p3 }
  0x14   :  { %4043 = shalt.err (!%p4040_p7)
}
  0x15   :  { %39 = dma.hbm_to_vmem [thread:$0]  %s4468_s1, 768, %s37_s28, [#allocation6]  }
  0x16   :  { %s4044_s21 = scalar_lea.hbm %s4470_s3, 16 }
  0x17   :  { %p4045_p8 = scmp.ne.s32.totalorder %s4470_s3, %s4044_s21  ;;  %p4048_p9 = scmp.lt.u32.totalorder %s4044_s21, %s4470_s3 }
  0x19   :  { %p4050_p10 = pnand %p4048_p9, %p4045_p8 }
  0x1b   :  { %4053 = shalt.err (!%p4050_p10)
}
  0x1c   :  { %s4054_s26 = scalar_lea.vmem %s59_s30, 16  ;;  %s4058_s27 = scalar_lea.vmem %s59_s30, 32 }
  0x1d   :  { %p4055_p11 = scmp.ne.s32.totalorder %s59_s30, %s4054_s26  ;;  %p4059_p12 = scmp.lt.s32.totalorder %s59_s30, %s59_s30 }
  0x1e   :  { %p4060_p13 = scmp.lt.s32.totalorder %s4058_s27, %s4054_s26 }
  0x20   :  { %p4061_p0 = por %p4060_p13, %p4059_p12 }
  0x22   :  { %p4062_p1 = pnand %p4061_p0, %p4055_p11 }
  0x24   :  { %4065 = shalt.err (!%p4062_p1)
}
  0x25   :  { %61 = dma.hbm_to_vmem [thread:$0]  %s4470_s3, 16, %s59_s30, [#allocation9]  }
  0x26   :  { %s4234_s29 = smov [#allocation2]   ;;  %s4235_s10 = smov [#allocation7]  }
  0x27   :  { %s26_s9 = sshll.u32 %s4234_s29, 4  ;;  %s45_s11 = sshll.u32 %s4235_s10, 4  ;;  %s27_s9 = int_to_ptr.vmem [resolvable:$true] %s26_s9  ;;  %s4314_s11 = int_to_ptr.vmem [resolvable:$true] %s45_s11 }
  0x28   :  { %s4066_s14 = scalar_lea.hbm %s4467_s0, 768 }
  0x29   :  { %p4067_p2 = scmp.ne.s32.totalorder %s4467_s0, %s4066_s14  ;;  %p4070_p3 = scmp.lt.u32.totalorder %s4066_s14, %s4467_s0 }
  0x2b   :  { %p4072_p4 = pnand %p4070_p3, %p4067_p2 }
  0x2d   :  { %4075 = shalt.err (!%p4072_p4)
}
  0x2e   :  { %s4076_s3 = scalar_lea.vmem %s27_s9, 768  ;;  %p4081_p6 = scmp.lt.s32.totalorder %s27_s9, %s27_s9 }
  0x2f   :  { %p4077_p5 = scmp.ne.s32.totalorder %s27_s9, %s4076_s3  ;;  %p4082_p7 = scmp.lt.s32.totalorder %s4076_s3, %s4076_s3 }
  0x31   :  { %p4083_p8 = por %p4082_p7, %p4081_p6 }
  0x33   :  { %p4084_p9 = pnand %p4083_p8, %p4077_p5 }
  0x35   :  { %4087 = shalt.err (!%p4084_p9)
}
  0x36   :  { %29 = dma.hbm_to_vmem [thread:$0]  %s4467_s0, 768, %s27_s9, [#allocation3]  }
  0x37   :  { %s4088_s22 = scalar_lea.hbm %s4469_s2, 6144 }
  0x38   :  { %p4089_p10 = scmp.ne.s32.totalorder %s4469_s2, %s4088_s22  ;;  %p4092_p11 = scmp.lt.u32.totalorder %s4088_s22, %s4469_s2 }
  0x3a   :  { %p4094_p12 = pnand %p4092_p11, %p4089_p10 }
  0x3c   :  { %4097 = shalt.err (!%p4094_p12)
}
  0x3d   :  { %s4098_s27 = scalar_lea.vmem %s4314_s11, 6144  ;;  %p4103_p0 = scmp.lt.s32.totalorder %s4314_s11, %s4314_s11 }
  0x3e   :  { %p4099_p13 = scmp.ne.s32.totalorder %s4314_s11, %s4098_s27  ;;  %p4104_p1 = scmp.lt.s32.totalorder %s4098_s27, %s4098_s27 }
  0x40   :  { %p4105_p2 = por %p4104_p1, %p4103_p0 }
  0x42   :  { %p4106_p3 = pnand %p4105_p2, %p4099_p13 }
  0x44   :  { %4109 = shalt.err (!%p4106_p3)
}
  0x45   :  { %s4236_s0 = smov 64   ;;  %s4237_s1 = smov 4  }
  0x46   :  { %51 = dma.hbm_to_vmem [thread:$0]  %s4469_s2, 6144, %s4314_s11, [#allocation6], %s4236_s0, %s4236_s0, %s4237_s1  }
  0x47   :  { %s4238_s9 = smov [#allocation10]   ;;  %s4110_s14 = scalar_lea.hbm %s4471_s4, 36864 }
  0x48   :  { %s67_s10 = sshll.u32 %s4238_s9, 4  ;;  %p4111_p4 = scmp.ne.s32.totalorder %s4471_s4, %s4110_s14  ;;  %s68_s10 = int_to_ptr.vmem [resolvable:$true] %s67_s10 }
  0x49   :  { %p4114_p5 = scmp.lt.u32.totalorder %s4110_s14, %s4471_s4 }
  0x4b   :  { %p4116_p6 = pnand %p4114_p5, %p4111_p4 }
  0x4d   :  { %4119 = shalt.err (!%p4116_p6)
}
  0x4e   :  { %s4120_s3 = scalar_lea.vmem %s68_s10, 36864  ;;  %p4125_p8 = scmp.lt.s32.totalorder %s68_s10, %s68_s10 }
  0x4f   :  { %p4121_p7 = scmp.ne.s32.totalorder %s68_s10, %s4120_s3  ;;  %p4126_p9 = scmp.lt.s32.totalorder %s4120_s3, %s4120_s3 }
  0x51   :  { %p4127_p10 = por %p4126_p9, %p4125_p8 }
  0x53   :  { %p4128_p11 = pnand %p4127_p10, %p4121_p7 }
  0x55   :  { %4131 = shalt.err (!%p4128_p11)
}
  0x56   :  { %s4239_s2 = smov 384   ;;  %s4240_s11 = smov 24  }
  0x57   :  { %73 = dma.hbm_to_vmem [thread:$0]  %s4471_s4, 36864, %s68_s10, [#allocation9], %s4239_s2, %s4239_s2, %s4240_s11  }
  0x58   :  { %s4241_s20 = smov [#allocation11]   ;;  %s4132_s24 = scalar_lea.hbm %s4472_s5, 96 }
  0x59   :  { %s80_s21 = sshll.u32 %s4241_s20, 4  ;;  %p4133_p12 = scmp.ne.s32.totalorder %s4472_s5, %s4132_s24  ;;  %s81_s21 = int_to_ptr.vmem [resolvable:$true] %s80_s21 }
  0x5a   :  { %p4136_p13 = scmp.lt.u32.totalorder %s4132_s24, %s4472_s5 }
  0x5c   :  { %p4138_p0 = pnand %p4136_p13, %p4133_p12 }
  0x5e   :  { %4141 = shalt.err (!%p4138_p0)
}
  0x5f   :  { %s4142_s1 = scalar_lea.vmem %s81_s21, 96  ;;  %p4147_p2 = scmp.lt.s32.totalorder %s81_s21, %s81_s21 }
  0x60   :  { %p4143_p1 = scmp.ne.s32.totalorder %s81_s21, %s4142_s1  ;;  %p4148_p3 = scmp.lt.s32.totalorder %s4142_s1, %s4142_s1 }
  0x62   :  { %p4149_p4 = por %p4148_p3, %p4147_p2 }
  0x64   :  { %p4150_p5 = pnand %p4149_p4, %p4143_p1 }
  0x66   :  { %4153 = shalt.err (!%p4150_p5)
}
  0x67   :  { %83 = dma.hbm_to_vmem [thread:$0]  %s4472_s5, 96, %s81_s21, [#allocation12]  }
  0x68   :  { %4220 = dma.done.wait [#allocation3], 768  }
  0x69   :  { %4221 = vsyncadd [#allocation3], 4294966528 }
  0x6a   :  { %4222 = dma.done.wait [#allocation6], 6912  }
  0x6b   :  { %4223 = vsyncadd [#allocation6], 4294960384 }
  0x6c   :  { %4224 = dma.done.wait [#allocation9], 36880  }
  0x6d   :  { %4225 = vsyncadd [#allocation9], 4294930416 }
  0x6e   :  { %4226 = dma.done.wait [#allocation12], 96  }
  0x6f   :  { %4227 = vsyncadd [#allocation12], 4294967200  ;;  %v3482_v0 = vld [vmem:[#allocation7 + $0x40] sm:$0xff]   ;;  %v3487_v4 = vld [vmem:[#allocation7 + $0x48] sm:$0xff]   ;;  %s4242_s5 = smov [#allocation13]  }
  0x70   :  { %v3483_v1 = vld [vmem:[#allocation10 + $0x4] ss:$24 sps:$4 sm:$0xff]   ;;  %3307 = vmatprep.subr.bf16.mxu0 %v3482_v0  ;;  %v3486_v3 = vld [vmem:[#allocation10] ss:$24 sps:$4 sm:$0xff]   ;;  %v3488_v5 = vld [vmem:[#allocation10 + $0x34] ss:$24 sps:$4 sm:$0xff]  }
  0x71   :  { %v3485_v2 = vld [vmem:[#allocation7] sm:$0xff]   ;;  %2399 = vmatprep.subr.bf16.mxu1 %v3483_v1  ;;  %v3490_v6 = vld [vmem:[#allocation7 + $0x8] sm:$0xff]   ;;  %v3492_v8 = vld [vmem:[#allocation7 + $0x50] sm:$0xff]   ;;  %s2931_s29 = sshll.u32 %s4242_s5, 4  ;;  %s2932_s29 = int_to_ptr.vmem [resolvable:$true] %s2931_s29 }
  0x72   :  { %3308 = vmatpush3.bf16.msra.mxu0 %v3485_v2  ;;  %2400 = vmatpush1.bf16.msra.mxu1 %v3486_v3  ;;  %v3491_v7 = vld [vmem:[#allocation10 + $0x30] ss:$24 sps:$4 sm:$0xff]   ;;  %v3493_v9 = vld [vmem:[#allocation10 + $0x64] ss:$24 sps:$4 sm:$0xff]   ;;  %v3496_v11 = vld [vmem:[#allocation10 + $0x60] ss:$24 sps:$4 sm:$0xff]   ;;  %p4159_p7 = scmp.lt.s32.totalorder %s2932_s29, %s2932_s29 }
  0x73   :  { %3309 = vmatprep.subr.bf16.mxu0 %v3487_v4  ;;  %2401 = vmatprep.subr.bf16.mxu1 %v3488_v5  ;;  %v3495_v10 = vld [vmem:[#allocation7 + $0x10] sm:$0xff]   ;;  %v3497_v12 = vld [vmem:[#allocation7 + $0x58] sm:$0xff]   ;;  %v3502_v16 = vld [vmem:[#allocation7 + $0x60] sm:$0xff]   ;;  %s4154_s9 = scalar_lea.vmem %s2932_s29, 128 }
  0x74   :  { %v3498_v13 = vld [vmem:[#allocation10 + $0x94] ss:$24 sps:$4 sm:$0xff]   ;;  %v3501_v15 = vld [vmem:[#allocation10 + $0x90] ss:$24 sps:$4 sm:$0xff]   ;;  %v3503_v17 = vld [vmem:[#allocation10 + $0xc4] ss:$24 sps:$4 sm:$0xff]   ;;  %p4155_p6 = scmp.ne.s32.totalorder %s2932_s29, %s4154_s9  ;;  %p4160_p8 = scmp.lt.s32.totalorder %s4154_s9, %s4154_s9 }
  0x75   :  { %v3500_v14 = vld [vmem:[#allocation7 + $0x18] sm:$0xff]   ;;  %v3505_v18 = vld [vmem:[#allocation7 + $0x20] sm:$0xff]   ;;  %v3507_v20 = vld [vmem:[#allocation7 + $0x68] sm:$0xff]  }
  0x76   :  { %3310 = vmatpush3.bf16.msra.mxu0 %v3490_v6  ;;  %2402 = vmatpush1.bf16.msra.mxu1 %v3491_v7  ;;  %v3506_v19 = vld [vmem:[#allocation10 + $0xc0] ss:$24 sps:$4 sm:$0xff]   ;;  %v3508_v21 = vld [vmem:[#allocation10 + $0xf4] ss:$24 sps:$4 sm:$0xff]   ;;  %v3511_v23 = vld [vmem:[#allocation10 + $0xf0] ss:$24 sps:$4 sm:$0xff]   ;;  %p4161_p9 = por %p4160_p8, %p4159_p7 }
  0x77   :  { %3311 = vmatprep.subr.bf16.mxu0 %v3492_v8  ;;  %2403 = vmatprep.subr.bf16.mxu1 %v3493_v9  ;;  %v3510_v22 = vld [vmem:[#allocation7 + $0x28] sm:$0xff]   ;;  %v3512_v24 = vld [vmem:[#allocation7 + $0x70] sm:$0xff]   ;;  %v3516_v27 = vld [vmem:[#allocation10 + $0x120] ss:$24 sps:$4 sm:$0xff]  }
  0x78   :  { %v3513_v25 = vld [vmem:[#allocation10 + $0x124] ss:$24 sps:$4 sm:$0xff]   ;;  %v3515_v26 = vld [vmem:[#allocation7 + $0x30] sm:$0xff]   ;;  %v3526_v42 = vld [vmem:[#allocation10 + $0x180] ss:$24 sps:$4 sm:$0xff]   ;;  %p4162_p10 = pnand %p4161_p9, %p4155_p6 }
  0x79   :  { %v3517_v28 = vld [vmem:[#allocation7 + $0x78] sm:$0xff]   ;;  %v201_v30 = vld [vmem:[#allocation2 + $0x8] sm:$0xff]  ;;  %v200_v35 = vld [vmem:[#allocation2] sm:$0xff] }
  0x7a   :  { %3312 = vmatpush3.bf16.msra.mxu0 %v3495_v10  ;;  %2404 = vmatpush1.bf16.msra.mxu1 %v3496_v11  ;;  %v3518_v29 = vld [vmem:[#allocation10 + $0x154] ss:$24 sps:$4 sm:$0xff]   ;;  %v207_v32 = vmax.f32 %v201_v30, 0.0  ;;  %v3521_v33 = vld [vmem:[#allocation10 + $0x150] ss:$24 sps:$4 sm:$0xff]   ;;  %v3522_v36 = vld [vmem:[#allocation7 + $0xc0] sm:$0xff]  }
  0x7b   :  { %3313 = vmatprep.subr.bf16.mxu0 %v3497_v12  ;;  %2405 = vmatprep.subr.bf16.mxu1 %v3498_v13  ;;  %v3520_v31 = vld [vmem:[#allocation7 + $0x38] sm:$0xff]   ;;  %v206_v38 = vmax.f32 %v200_v35, 0.0  ;;  %v3525_v41 = vld [vmem:[#allocation7 + $0x80] sm:$0xff]   ;;  %v3527_v43 = vld [vmem:[#allocation7 + $0xc8] sm:$0xff]  }
  0x7c   :  { %v213_v34 = vmin.f32 %v207_v32, 1.0  ;;  %v3523_v37 = vld [vmem:[#allocation10 + $0x184] ss:$24 sps:$4 sm:$0xff]   ;;  %v3528_v45 = vld [vmem:[#allocation10 + $0x1b4] ss:$24 sps:$4 sm:$0xff]  }
  0x7d   :  { %v212_v40 = vmin.f32 %v206_v38, 1.0  ;;  %v3530_v46 = vld [vmem:[#allocation7 + $0x88] sm:$0xff]   ;;  %v3532_v48 = vld [vmem:[#allocation7 + $0xd0] sm:$0xff]   ;;  %v3536_v51 = vld [vmem:[#allocation10 + $0x1e0] ss:$24 sps:$4 sm:$0xff]  }
  0x7e   :  { %3314 = vmatpush3.bf16.msra.mxu0 %v3500_v14  ;;  %2406 = vmatpush1.bf16.msra.mxu1 %v3501_v15  ;;  %v4369_v39 = vpack.c.bf16 %v213_v34, %v213_v34  ;;  %v3531_v47 = vld [vmem:[#allocation10 + $0x1b0] ss:$24 sps:$4 sm:$0xff]   ;;  %v3533_v49 = vld [vmem:[#allocation10 + $0x1e4] ss:$24 sps:$4 sm:$0xff]   ;;  %v3538_v53 = vld [vmem:[#allocation10 + $0x214] ss:$24 sps:$4 sm:$0xff]  }
  0x7f   :  { %3315 = vmatprep.subr.bf16.mxu0 %v3502_v16  ;;  %2407 = vmatprep.subr.bf16.mxu1 %v3503_v17  ;;  %v4372_v44 = vpack.c.bf16 %v212_v40, %v212_v40  ;;  %v3535_v50 = vld [vmem:[#allocation7 + $0x90] sm:$0xff]   ;;  %v3537_v52 = vld [vmem:[#allocation7 + $0xd8] sm:$0xff]   ;;  %v3542_v56 = vld [vmem:[#allocation7 + $0xe0] sm:$0xff]  }
  0x80   :  { %550 = vmatprep.mubr.bf16.mxu0 %v4369_v39  ;;  %2431 = vmatprep.mubr.bf16.mxu1 %v4369_v39  ;;  %v3540_v54 = vld [vmem:[#allocation7 + $0x98] sm:$0xff]   ;;  %v3541_v55 = vld [vmem:[#allocation10 + $0x210] ss:$24 sps:$4 sm:$0xff]   ;;  %v3545_v58 = vld [vmem:[#allocation7 + $0xa0] sm:$0xff]  }
  0x81   :  { %v3543_v57 = vld [vmem:[#allocation10 + $0x244] ss:$24 sps:$4 sm:$0xff]   ;;  %v3546_v59 = vld [vmem:[#allocation10 + $0x240] ss:$24 sps:$4 sm:$0xff]   ;;  %v3548_v61 = vld [vmem:[#allocation10 + $0x274] ss:$24 sps:$4 sm:$0xff]  }
  0x82   :  { %3316 = vmatpush3.bf16.msra.mxu0 %v3505_v18  ;;  %2408 = vmatpush1.bf16.msra.mxu1 %v3506_v19  ;;  %v3547_v60 = vld [vmem:[#allocation7 + $0xe8] sm:$0xff]   ;;  %v3552_v0 = vld [vmem:[#allocation7 + $0xf0] sm:$0xff]   ;;  %v203_v2 = vld [vmem:[#allocation2 + $0x18] sm:$0xff] }
  0x83   :  { %3317 = vmatprep.subr.bf16.mxu0 %v3507_v20  ;;  %2409 = vmatprep.subr.bf16.mxu1 %v3508_v21  ;;  %v3550_v62 = vld [vmem:[#allocation7 + $0xa8] sm:$0xff]   ;;  %v202_v3 = vld [vmem:[#allocation2 + $0x10] sm:$0xff]  ;;  %v209_v4 = vmax.f32 %v203_v2, 0.0  ;;  %v3556_v6 = vld [vmem:[#allocation10 + $0x2a0] ss:$24 sps:$4 sm:$0xff]  }
  0x84   :  { %v3551_v63 = vld [vmem:[#allocation10 + $0x270] ss:$24 sps:$4 sm:$0xff]   ;;  %v3553_v1 = vld [vmem:[#allocation10 + $0x2a4] ss:$24 sps:$4 sm:$0xff]   ;;  %v208_v7 = vmax.f32 %v202_v3, 0.0 }
  0x85   :  { %v3555_v5 = vld [vmem:[#allocation7 + $0xb0] sm:$0xff]   ;;  %v3557_v8 = vld [vmem:[#allocation7 + $0xf8] sm:$0xff]   ;;  %v215_v9 = vmin.f32 %v209_v4, 1.0  ;;  %v3562_v15 = vld [vmem:[#allocation7 + $0x140] sm:$0xff]  }
  0x86   :  { %3318 = vmatpush3.bf16.msra.mxu0 %v3510_v22  ;;  %2410 = vmatpush1.bf16.msra.mxu1 %v3511_v23  ;;  %v3558_v10 = vld [vmem:[#allocation10 + $0x2d4] ss:$24 sps:$4 sm:$0xff]   ;;  %v3561_v13 = vld [vmem:[#allocation10 + $0x2d0] ss:$24 sps:$4 sm:$0xff]   ;;  %v214_v14 = vmin.f32 %v208_v7, 1.0  ;;  %v3566_v19 = vld [vmem:[#allocation7 + $0x100] sm:$0xff]  }
  0x87   :  { %3319 = vmatprep.subr.bf16.mxu0 %v3512_v24  ;;  %2411 = vmatprep.subr.bf16.mxu1 %v3513_v25  ;;  %v4376_v11 = vpack.c.bf16 %v215_v9, %v215_v9  ;;  %v3560_v12 = vld [vmem:[#allocation7 + $0xb8] sm:$0xff]   ;;  %v3567_v20 = vld [vmem:[#allocation7 + $0x148] sm:$0xff]   ;;  %v3572_v24 = vld [vmem:[#allocation7 + $0x150] sm:$0xff]  }
  0x88   :  { %v3565_v16 = vld [vmem:[#allocation10 + $0x304] ss:$24 sps:$4 sm:$0xff]   ;;  %v3563_v17 = vld [vmem:[#allocation10 + $0x300] ss:$24 sps:$4 sm:$0xff]   ;;  %v4379_v18 = vpack.c.bf16 %v214_v14, %v214_v14  ;;  %v3570_v21 = vld [vmem:[#allocation10 + $0x334] ss:$24 sps:$4 sm:$0xff]  }
  0x89   :  { %v3568_v22 = vld [vmem:[#allocation10 + $0x330] ss:$24 sps:$4 sm:$0xff]   ;;  %v3575_v25 = vld [vmem:[#allocation10 + $0x364] ss:$24 sps:$4 sm:$0xff]   ;;  %v3583_v34 = vld [vmem:[#allocation10 + $0x3c0] ss:$24 sps:$4 sm:$0xff]  }
  0x8a   :  { %3320 = vmatpush3.bf16.msra.mxu0 %v3515_v26  ;;  %2412 = vmatpush1.bf16.msra.mxu1 %v3516_v27  ;;  %v3571_v23 = vld [vmem:[#allocation7 + $0x108] sm:$0xff]   ;;  %v3573_v26 = vld [vmem:[#allocation10 + $0x360] ss:$24 sps:$4 sm:$0xff]   ;;  %v3576_v27 = vld [vmem:[#allocation7 + $0x110] sm:$0xff]  }
  0x8b   :  { %3321 = vmatprep.subr.bf16.mxu0 %v3517_v28  ;;  %2413 = vmatprep.subr.bf16.mxu1 %v3518_v29  ;;  %v3577_v28 = vld [vmem:[#allocation7 + $0x158] sm:$0xff]   ;;  %v3578_v30 = vld [vmem:[#allocation10 + $0x390] ss:$24 sps:$4 sm:$0xff]   ;;  %v3582_v32 = vld [vmem:[#allocation7 + $0x160] sm:$0xff]  }
  0x8c   :  { %v3580_v29 = vld [vmem:[#allocation10 + $0x394] ss:$24 sps:$4 sm:$0xff]   ;;  %v3586_v35 = vld [vmem:[#allocation7 + $0x120] sm:$0xff]   ;;  %v3623_v9 = vld [vmem:[#allocation10 + $0x98] ss:$24 sps:$4 sm:$0xff]  }
  0x8d   :  { %v3590_v38 = vld [vmem:[#allocation10 + $0x3f4] ss:$24 sps:$4 sm:$0xff]   ;;  %v3616_v2 = vld [vmem:[#allocation10 + $0x4e4] ss:$24 sps:$4 sm:$0xff]   ;;  %v3614_v4 = vld [vmem:[#allocation10 + $0x4e0] ss:$24 sps:$4 sm:$0xff]  }
  0x8e   :  { %3322 = vmatpush3.bf16.msra.mxu0 %v3520_v31  ;;  %2414 = vmatpush1.bf16.msra.mxu1 %v3521_v33  ;;  %v3581_v31 = vld [vmem:[#allocation7 + $0x118] sm:$0xff]   ;;  %v3619_v3 = vld [vmem:[#allocation10 + $0x6c] ss:$24 sps:$4 sm:$0xff]   ;;  %v3629_v14 = vld [vmem:[#allocation10 + $0xc8] ss:$24 sps:$4 sm:$0xff]  }
  0x8f   :  { %3329 = vmatprep.subr.bf16.mxu0 %v3522_v36  ;;  %2415 = vmatprep.subr.bf16.mxu1 %v3523_v37  ;;  %v3585_v33 = vld [vmem:[#allocation10 + $0x3c4] ss:$24 sps:$4 sm:$0xff]  }
  0x90   :  { %v3587_v36 = vld [vmem:[#allocation7 + $0x168] sm:$0xff]   ;;  %v3625_v7 = vld [vmem:[#allocation10 + $0x9c] ss:$24 sps:$4 sm:$0xff]  }
  0x91   :  { %551 = vmatmul.mubr.bf16.vlgmr.msra.gmra.mrb[0].mxu0 %v4372_v44  ;;  %v205_v37 = vld [vmem:[#allocation2 + $0x28] sm:$0xff] }
  0x92   :  { %3330 = vmatpush3.bf16.msra.mxu0 %v3525_v41  ;;  %2416 = vmatpush1.bf16.msra.mxu1 %v3526_v42  ;;  %v211_v40 = vmax.f32 %v205_v37, 0.0  ;;  %v3588_v41 = vld [vmem:[#allocation10 + $0x3f0] ss:$24 sps:$4 sm:$0xff]   ;;  %v3667_v37 = vld [vmem:[#allocation10 + $0x1ec] ss:$24 sps:$4 sm:$0xff]  }
  0x93   :  { %3331 = vmatprep.subr.bf16.mxu0 %v3527_v43  ;;  %2417 = vmatprep.subr.bf16.mxu1 %v3528_v45  ;;  %v3591_v42 = vld [vmem:[#allocation7 + $0x128] sm:$0xff]   ;;  %v3592_v43 = vld [vmem:[#allocation7 + $0x170] sm:$0xff]  }
  0x94   :  { %590 = vmatprep.mubr.bf16.mxu0 %v4376_v11  ;;  %v217_v45 = vmin.f32 %v211_v40, 1.0  ;;  %v3665_v40 = vld [vmem:[#allocation10 + $0x1e8] ss:$24 sps:$4 sm:$0xff]  }
  0x96   :  { %3332 = vmatpush3.bf16.msra.mxu0 %v3530_v46  ;;  %2418 = vmatpush1.bf16.msra.mxu1 %v3531_v47  ;;  %v204_v46 = vld [vmem:[#allocation2 + $0x20] sm:$0xff] }
  0x97   :  { %3333 = vmatprep.subr.bf16.mxu0 %v3532_v48  ;;  %2419 = vmatprep.subr.bf16.mxu1 %v3533_v49  ;;  %v3595_v47 = vld [vmem:[#allocation10 + $0x424] ss:$24 sps:$4 sm:$0xff]   ;;  %v4384_v48 = vpack.c.bf16 %v217_v45, %v217_v45  ;;  %v3593_v49 = vld [vmem:[#allocation10 + $0x420] ss:$24 sps:$4 sm:$0xff]  }
  0x98   :  { %v3671_v45 = vld [vmem:[#allocation10 + $0x218] ss:$24 sps:$4 sm:$0xff]  }
  0x9a   :  { %3334 = vmatpush3.bf16.msra.mxu0 %v3535_v50  ;;  %2420 = vmatpush1.bf16.msra.mxu1 %v3536_v51  ;;  %v3596_v50 = vld [vmem:[#allocation7 + $0x130] sm:$0xff]   ;;  %v210_v51 = vmax.f32 %v204_v46, 0.0  ;;  %v3676_v46 = vld [vmem:[#allocation10 + $0x6c4] ss:$24 sps:$4 sm:$0xff]  }
  0x9b   :  { %3335 = vmatprep.subr.bf16.mxu0 %v3537_v52  ;;  %2421 = vmatprep.subr.bf16.mxu1 %v3538_v53  ;;  %v3597_v52 = vld [vmem:[#allocation7 + $0x178] sm:$0xff]  }
  0x9c   :  { %v3600_v53 = vld [vmem:[#allocation10 + $0x454] ss:$24 sps:$4 sm:$0xff]  }
  0x9e   :  { %3336 = vmatpush3.bf16.msra.mxu0 %v3540_v54  ;;  %2422 = vmatpush1.bf16.msra.mxu1 %v3541_v55  ;;  %v3598_v54 = vld [vmem:[#allocation10 + $0x450] ss:$24 sps:$4 sm:$0xff]   ;;  %v3601_v55 = vld [vmem:[#allocation7 + $0x138] sm:$0xff]  }
  0x9f   :  { %3337 = vmatprep.subr.bf16.mxu0 %v3542_v56  ;;  %2423 = vmatprep.subr.bf16.mxu1 %v3543_v57  ;;  %v216_v56 = vmin.f32 %v210_v51, 1.0  ;;  %v3604_v57 = vld [vmem:[#allocation10 + $0x484] ss:$24 sps:$4 sm:$0xff]   ;;  %v3682_v51 = vld [vmem:[#allocation10 + $0x6f4] ss:$24 sps:$4 sm:$0xff]  }
  0xa2   :  { %3338 = vmatpush3.bf16.msra.mxu0 %v3545_v58  ;;  %2424 = vmatpush1.bf16.msra.mxu1 %v3546_v59  ;;  %v3607_v58 = vld [vmem:[#allocation10 + $0xc] ss:$24 sps:$4 sm:$0xff]   ;;  %v4387_v59 = vpack.c.bf16 %v216_v56, %v216_v56 }
  0xa3   :  { %3339 = vmatprep.subr.bf16.mxu0 %v3547_v60  ;;  %2425 = vmatprep.subr.bf16.mxu1 %v3548_v61  ;;  %v3602_v60 = vld [vmem:[#allocation10 + $0x480] ss:$24 sps:$4 sm:$0xff]   ;;  %v3691_v56 = vld [vmem:[#allocation10 + $0x2ac] ss:$24 sps:$4 sm:$0xff]  }
  0xa4   :  { %v3605_v61 = vld [vmem:[#allocation10 + $0x8] ss:$24 sps:$4 sm:$0xff]  }
  0xa6   :  { %3340 = vmatpush3.bf16.msra.mxu0 %v3550_v62  ;;  %2426 = vmatpush1.bf16.msra.mxu1 %v3551_v63  ;;  %v3610_v62 = vld [vmem:[#allocation10 + $0x4b4] ss:$24 sps:$4 sm:$0xff]  }
  0xa7   :  { %3341 = vmatprep.subr.bf16.mxu0 %v3552_v0  ;;  %2427 = vmatprep.subr.bf16.mxu1 %v3553_v1  ;;  %v3613_v63 = vld [vmem:[#allocation10 + $0x3c] ss:$24 sps:$4 sm:$0xff]   ;;  %v3608_v0 = vld [vmem:[#allocation10 + $0x4b0] ss:$24 sps:$4 sm:$0xff]  }
  0xa8   :  { %v3611_v1 = vld [vmem:[#allocation10 + $0x38] ss:$24 sps:$4 sm:$0xff]  }
  0xaa   :  { %3342 = vmatpush3.bf16.msra.mxu0 %v3555_v5  ;;  %2428 = vmatpush1.bf16.msra.mxu1 %v3556_v6  ;;  %v3617_v5 = vld [vmem:[#allocation10 + $0x68] ss:$24 sps:$4 sm:$0xff]   ;;  %v3622_v6 = vld [vmem:[#allocation10 + $0x514] ss:$24 sps:$4 sm:$0xff]  }
  0xab   :  { %3343 = vmatprep.subr.bf16.mxu0 %v3557_v8  ;;  %2429 = vmatprep.subr.bf16.mxu1 %v3558_v10  ;;  %v3620_v8 = vld [vmem:[#allocation10 + $0x510] ss:$24 sps:$4 sm:$0xff]   ;;  %v3628_v10 = vld [vmem:[#allocation10 + $0x544] ss:$24 sps:$4 sm:$0xff]  }
  0xae   :  { %3344 = vmatpush3.bf16.msra.mxu0 %v3560_v12  ;;  %2430 = vmatpush1.bf16.msra.mxu1 %v3561_v13  ;;  %v3631_v12 = vld [vmem:[#allocation10 + $0xcc] ss:$24 sps:$4 sm:$0xff]   ;;  %v3626_v13 = vld [vmem:[#allocation10 + $0x540] ss:$24 sps:$4 sm:$0xff]  }
  0xaf   :  { %3351 = vmatprep.subr.bf16.mxu0 %v3562_v15  ;;  %2440 = vmatprep.subr.bf16.mxu1 %v3565_v16  ;;  %v3634_v15 = vld [vmem:[#allocation10 + $0x574] ss:$24 sps:$4 sm:$0xff]  }
  0xb0   :  { %v3637_v16 = vld [vmem:[#allocation10 + $0xfc] ss:$24 sps:$4 sm:$0xff]  }
  0xb1   :  { %591 = vmatmul.mubr.bf16.vlgmr.msra.gmra.mrb[4].mxu0 %v4379_v18  ;;  %2432 = vmatmul.mubr.bf16.vlgmr.msra.gmra.mrb[0].mxu1 %v4372_v44 }
  0xb2   :  { %3352 = vmatpush3.bf16.msra.mxu0 %v3566_v19  ;;  %2441 = vmatpush1.bf16.msra.mxu1 %v3563_v17  ;;  %v3632_v17 = vld [vmem:[#allocation10 + $0x570] ss:$24 sps:$4 sm:$0xff]  }
  0xb3   :  { %3353 = vmatprep.subr.bf16.mxu0 %v3567_v20  ;;  %2442 = vmatprep.subr.bf16.mxu1 %v3570_v21  ;;  %v3635_v19 = vld [vmem:[#allocation10 + $0xf8] ss:$24 sps:$4 sm:$0xff]   ;;  %v3640_v20 = vld [vmem:[#allocation10 + $0x5a4] ss:$24 sps:$4 sm:$0xff]  }
  0xb4   :  { %2472 = vmatprep.mubr.bf16.mxu1 %v4376_v11  ;;  %630 = vmatprep.mubr.bf16.mxu0 %v4384_v48  ;;  %v3643_v21 = vld [vmem:[#allocation10 + $0x12c] ss:$24 sps:$4 sm:$0xff]  }
  0xb6   :  { %3354 = vmatpush3.bf16.msra.mxu0 %v3571_v23  ;;  %2443 = vmatpush1.bf16.msra.mxu1 %v3568_v22  ;;  %v3638_v22 = vld [vmem:[#allocation10 + $0x5a0] ss:$24 sps:$4 sm:$0xff]  }
  0xb7   :  { %3355 = vmatprep.subr.bf16.mxu0 %v3572_v24  ;;  %2444 = vmatprep.subr.bf16.mxu1 %v3575_v25  ;;  %v3641_v23 = vld [vmem:[#allocation10 + $0x128] ss:$24 sps:$4 sm:$0xff]   ;;  %v3646_v24 = vld [vmem:[#allocation10 + $0x5d4] ss:$24 sps:$4 sm:$0xff]  }
  0xb8   :  { %v3649_v25 = vld [vmem:[#allocation10 + $0x15c] ss:$24 sps:$4 sm:$0xff]  }
  0xba   :  { %3356 = vmatpush3.bf16.msra.mxu0 %v3576_v27  ;;  %2445 = vmatpush1.bf16.msra.mxu1 %v3573_v26  ;;  %v3644_v26 = vld [vmem:[#allocation10 + $0x5d0] ss:$24 sps:$4 sm:$0xff]  }
  0xbb   :  { %3357 = vmatprep.subr.bf16.mxu0 %v3577_v28  ;;  %2446 = vmatprep.subr.bf16.mxu1 %v3580_v29  ;;  %v3647_v27 = vld [vmem:[#allocation10 + $0x158] ss:$24 sps:$4 sm:$0xff]   ;;  %v3652_v28 = vld [vmem:[#allocation10 + $0x604] ss:$24 sps:$4 sm:$0xff]  }
  0xbc   :  { %v3655_v29 = vld [vmem:[#allocation10 + $0x18c] ss:$24 sps:$4 sm:$0xff]  }
  0xbe   :  { %3358 = vmatpush3.bf16.msra.mxu0 %v3581_v31  ;;  %2447 = vmatpush1.bf16.msra.mxu1 %v3578_v30  ;;  %v3650_v30 = vld [vmem:[#allocation10 + $0x600] ss:$24 sps:$4 sm:$0xff]  }
  0xbf   :  { %3359 = vmatprep.subr.bf16.mxu0 %v3582_v32  ;;  %2448 = vmatprep.subr.bf16.mxu1 %v3585_v33  ;;  %v3653_v31 = vld [vmem:[#allocation10 + $0x188] ss:$24 sps:$4 sm:$0xff]   ;;  %v3658_v32 = vld [vmem:[#allocation10 + $0x634] ss:$24 sps:$4 sm:$0xff]  }
  0xc0   :  { %v3661_v33 = vld [vmem:[#allocation10 + $0x1bc] ss:$24 sps:$4 sm:$0xff]  }
  0xc2   :  { %3360 = vmatpush3.bf16.msra.mxu0 %v3586_v35  ;;  %2449 = vmatpush1.bf16.msra.mxu1 %v3583_v34  ;;  %v3656_v34 = vld [vmem:[#allocation10 + $0x630] ss:$24 sps:$4 sm:$0xff]  }
  0xc3   :  { %3361 = vmatprep.subr.bf16.mxu0 %v3587_v36  ;;  %2450 = vmatprep.subr.bf16.mxu1 %v3590_v38  ;;  %v3659_v35 = vld [vmem:[#allocation10 + $0x1b8] ss:$24 sps:$4 sm:$0xff]   ;;  %v3664_v36 = vld [vmem:[#allocation10 + $0x664] ss:$24 sps:$4 sm:$0xff]  }
  0xc4   :  { %v3662_v38 = vld [vmem:[#allocation10 + $0x660] ss:$24 sps:$4 sm:$0xff]  }
  0xc6   :  { %3362 = vmatpush3.bf16.msra.mxu0 %v3591_v42  ;;  %2451 = vmatpush1.bf16.msra.mxu1 %v3588_v41  ;;  %v3670_v41 = vld [vmem:[#allocation10 + $0x694] ss:$24 sps:$4 sm:$0xff]  }
  0xc7   :  { %3363 = vmatprep.subr.bf16.mxu0 %v3592_v43  ;;  %2452 = vmatprep.subr.bf16.mxu1 %v3595_v47  ;;  %v3673_v42 = vld [vmem:[#allocation10 + $0x21c] ss:$24 sps:$4 sm:$0xff]   ;;  %v3668_v43 = vld [vmem:[#allocation10 + $0x690] ss:$24 sps:$4 sm:$0xff]   ;;  %v3679_v47 = vld [vmem:[#allocation10 + $0x24c] ss:$24 sps:$4 sm:$0xff]  }
  0xca   :  { %3364 = vmatpush3.bf16.msra.mxu0 %v3596_v50  ;;  %2453 = vmatpush1.bf16.msra.mxu1 %v3593_v49  ;;  %v3674_v49 = vld [vmem:[#allocation10 + $0x6c0] ss:$24 sps:$4 sm:$0xff]  }
  0xcb   :  { %3365 = vmatprep.subr.bf16.mxu0 %v3597_v52  ;;  %2454 = vmatprep.subr.bf16.mxu1 %v3600_v53  ;;  %v3677_v50 = vld [vmem:[#allocation10 + $0x248] ss:$24 sps:$4 sm:$0xff]   ;;  %v3685_v52 = vld [vmem:[#allocation10 + $0x27c] ss:$24 sps:$4 sm:$0xff]  }
  0xcc   :  { %v3680_v53 = vld [vmem:[#allocation10 + $0x6f0] ss:$24 sps:$4 sm:$0xff]  }
  0xce   :  { %3366 = vmatpush3.bf16.msra.mxu0 %v3601_v55  ;;  %2455 = vmatpush1.bf16.msra.mxu1 %v3598_v54  ;;  %v3683_v54 = vld [vmem:[#allocation10 + $0x278] ss:$24 sps:$4 sm:$0xff]   ;;  %v3688_v55 = vld [vmem:[#allocation10 + $0x724] ss:$24 sps:$4 sm:$0xff]  }
  0xcf   :  { %2456 = vmatprep.subr.bf16.mxu1 %v3604_v57  ;;  %2522 = vmatprep.subr.bf16.mxu0 %v3607_v58  ;;  %v3686_v57 = vld [vmem:[#allocation10 + $0x720] ss:$24 sps:$4 sm:$0xff]  }
  0xd0   :  { %v3689_v58 = vld [vmem:[#allocation10 + $0x2a8] ss:$24 sps:$4 sm:$0xff]  }
  0xd1   :  { %631 = vmatmul.mubr.bf16.vlgmr.msra.gmra.mrb[8].mxu0 %v4387_v59 }
  0xd2   :  { %2457 = vmatpush1.bf16.msra.mxu1 %v3602_v60  ;;  %2523 = vmatpush1.bf16.msra.mxu0 %v3605_v61  ;;  %v3694_v60 = vld [vmem:[#allocation10 + $0x754] ss:$24 sps:$4 sm:$0xff]  }
  0xd3   :  { %2458 = vmatprep.subr.bf16.mxu1 %v3610_v62  ;;  %2524 = vmatprep.subr.bf16.mxu0 %v3613_v63  ;;  %v3697_v61 = vld [vmem:[#allocation10 + $0x2dc] ss:$24 sps:$4 sm:$0xff]   ;;  %v3692_v62 = vld [vmem:[#allocation10 + $0x750] ss:$24 sps:$4 sm:$0xff]  }
  0xd4   :  { %2554 = vmatprep.mubr.bf16.mxu0 %v4369_v39  ;;  %v3695_v63 = vld [vmem:[#allocation10 + $0x2d8] ss:$24 sps:$4 sm:$0xff]  }
  0xd6   :  { %2459 = vmatpush1.bf16.msra.mxu1 %v3608_v0  ;;  %2525 = vmatpush1.bf16.msra.mxu0 %v3611_v1  ;;  %v3700_v0 = vld [vmem:[#allocation10 + $0x784] ss:$24 sps:$4 sm:$0xff]  }
  0xd7   :  { %2460 = vmatprep.subr.bf16.mxu1 %v3616_v2  ;;  %2526 = vmatprep.subr.bf16.mxu0 %v3619_v3  ;;  %v3703_v1 = vld [vmem:[#allocation10 + $0x30c] ss:$24 sps:$4 sm:$0xff]   ;;  %v3698_v2 = vld [vmem:[#allocation10 + $0x780] ss:$24 sps:$4 sm:$0xff]  }
  0xd8   :  { %v3701_v3 = vld [vmem:[#allocation10 + $0x308] ss:$24 sps:$4 sm:$0xff]  }
  0xda   :  { %2461 = vmatpush1.bf16.msra.mxu1 %v3614_v4  ;;  %2527 = vmatpush1.bf16.msra.mxu0 %v3617_v5  ;;  %v3706_v4 = vld [vmem:[#allocation10 + $0x7b4] ss:$24 sps:$4 sm:$0xff]  }
  0xdb   :  { %2462 = vmatprep.subr.bf16.mxu1 %v3622_v6  ;;  %2528 = vmatprep.subr.bf16.mxu0 %v3625_v7  ;;  %v3709_v5 = vld [vmem:[#allocation10 + $0x33c] ss:$24 sps:$4 sm:$0xff]   ;;  %v3704_v6 = vld [vmem:[#allocation10 + $0x7b0] ss:$24 sps:$4 sm:$0xff]  }
  0xdc   :  { %v3707_v7 = vld [vmem:[#allocation10 + $0x338] ss:$24 sps:$4 sm:$0xff]  }
  0xde   :  { %2463 = vmatpush1.bf16.msra.mxu1 %v3620_v8  ;;  %2529 = vmatpush1.bf16.msra.mxu0 %v3623_v9  ;;  %v3712_v8 = vld [vmem:[#allocation10 + $0x7e4] ss:$24 sps:$4 sm:$0xff]  }
  0xdf   :  { %2464 = vmatprep.subr.bf16.mxu1 %v3628_v10  ;;  %2530 = vmatprep.subr.bf16.mxu0 %v3631_v12  ;;  %v3715_v9 = vld [vmem:[#allocation10 + $0x36c] ss:$24 sps:$4 sm:$0xff]   ;;  %v3710_v10 = vld [vmem:[#allocation10 + $0x7e0] ss:$24 sps:$4 sm:$0xff]  }
  0xe0   :  { %v3713_v12 = vld [vmem:[#allocation10 + $0x368] ss:$24 sps:$4 sm:$0xff]  }
  0xe2   :  { %2465 = vmatpush1.bf16.msra.mxu1 %v3626_v13  ;;  %2531 = vmatpush1.bf16.msra.mxu0 %v3629_v14  ;;  %v3718_v13 = vld [vmem:[#allocation10 + $0x814] ss:$24 sps:$4 sm:$0xff]  }
  0xe3   :  { %2466 = vmatprep.subr.bf16.mxu1 %v3634_v15  ;;  %2532 = vmatprep.subr.bf16.mxu0 %v3637_v16  ;;  %v3721_v14 = vld [vmem:[#allocation10 + $0x39c] ss:$24 sps:$4 sm:$0xff]   ;;  %v3716_v15 = vld [vmem:[#allocation10 + $0x810] ss:$24 sps:$4 sm:$0xff]  }
  0xe4   :  { %v3719_v16 = vld [vmem:[#allocation10 + $0x398] ss:$24 sps:$4 sm:$0xff]  }
  0xe6   :  { %2467 = vmatpush1.bf16.msra.mxu1 %v3632_v17  ;;  %2533 = vmatpush1.bf16.msra.mxu0 %v3635_v19  ;;  %v3724_v17 = vld [vmem:[#allocation10 + $0x844] ss:$24 sps:$4 sm:$0xff]  }
  0xe7   :  { %2468 = vmatprep.subr.bf16.mxu1 %v3640_v20  ;;  %2534 = vmatprep.subr.bf16.mxu0 %v3643_v21  ;;  %v3727_v19 = vld [vmem:[#allocation10 + $0x3cc] ss:$24 sps:$4 sm:$0xff]   ;;  %v3722_v20 = vld [vmem:[#allocation10 + $0x840] ss:$24 sps:$4 sm:$0xff]  }
  0xe8   :  { %v3725_v21 = vld [vmem:[#allocation10 + $0x3c8] ss:$24 sps:$4 sm:$0xff]  }
  0xea   :  { %2469 = vmatpush1.bf16.msra.mxu1 %v3638_v22  ;;  %2535 = vmatpush1.bf16.msra.mxu0 %v3641_v23  ;;  %v3730_v22 = vld [vmem:[#allocation10 + $0x874] ss:$24 sps:$4 sm:$0xff]  }
  0xeb   :  { %2470 = vmatprep.subr.bf16.mxu1 %v3646_v24  ;;  %2536 = vmatprep.subr.bf16.mxu0 %v3649_v25  ;;  %v3733_v23 = vld [vmem:[#allocation10 + $0x3fc] ss:$24 sps:$4 sm:$0xff]   ;;  %v3728_v24 = vld [vmem:[#allocation10 + $0x870] ss:$24 sps:$4 sm:$0xff]  }
  0xec   :  { %v3731_v25 = vld [vmem:[#allocation10 + $0x3f8] ss:$24 sps:$4 sm:$0xff]  }
  0xee   :  { %2471 = vmatpush1.bf16.msra.mxu1 %v3644_v26  ;;  %2537 = vmatpush1.bf16.msra.mxu0 %v3647_v27  ;;  %v3736_v26 = vld [vmem:[#allocation10 + $0x8a4] ss:$24 sps:$4 sm:$0xff]  }
  0xef   :  { %2481 = vmatprep.subr.bf16.mxu1 %v3652_v28  ;;  %2538 = vmatprep.subr.bf16.mxu0 %v3655_v29  ;;  %v3739_v27 = vld [vmem:[#allocation10 + $0x42c] ss:$24 sps:$4 sm:$0xff]   ;;  %v3734_v28 = vld [vmem:[#allocation10 + $0x8a0] ss:$24 sps:$4 sm:$0xff]  }
  0xf0   :  { %v3737_v29 = vld [vmem:[#allocation10 + $0x428] ss:$24 sps:$4 sm:$0xff]  }
  0xf1   :  { %2473 = vmatmul.mubr.bf16.vlgmr.msra.gmra.mrb[0].mxu1 %v4379_v18 }
  0xf2   :  { %2482 = vmatpush1.bf16.msra.mxu1 %v3650_v30  ;;  %2539 = vmatpush1.bf16.msra.mxu0 %v3653_v31  ;;  %v3742_v30 = vld [vmem:[#allocation10 + $0x8d4] ss:$24 sps:$4 sm:$0xff]  }
  0xf3   :  { %2483 = vmatprep.subr.bf16.mxu1 %v3658_v32  ;;  %2540 = vmatprep.subr.bf16.mxu0 %v3661_v33  ;;  %v3745_v31 = vld [vmem:[#allocation10 + $0x45c] ss:$24 sps:$4 sm:$0xff]   ;;  %v3740_v32 = vld [vmem:[#allocation10 + $0x8d0] ss:$24 sps:$4 sm:$0xff]  }
  0xf4   :  { %2513 = vmatprep.mubr.bf16.mxu1 %v4384_v48  ;;  %v3743_v33 = vld [vmem:[#allocation10 + $0x458] ss:$24 sps:$4 sm:$0xff]  }
  0xf6   :  { %2484 = vmatpush1.bf16.msra.mxu1 %v3656_v34  ;;  %2541 = vmatpush1.bf16.msra.mxu0 %v3659_v35  ;;  %v3748_v34 = vld [vmem:[#allocation10 + $0x48c] ss:$24 sps:$4 sm:$0xff]  }
  0xf7   :  { %2485 = vmatprep.subr.bf16.mxu1 %v3664_v36  ;;  %2542 = vmatprep.subr.bf16.mxu0 %v3667_v37  ;;  %v3751_v35 = vld [vmem:[#allocation10 + $0x14] ss:$24 sps:$4 sm:$0xff]   ;;  %v3746_v36 = vld [vmem:[#allocation10 + $0x488] ss:$24 sps:$4 sm:$0xff]  }
  0xf8   :  { %v3749_v37 = vld [vmem:[#allocation10 + $0x10] ss:$24 sps:$4 sm:$0xff]  }
  0xfa   :  { %2486 = vmatpush1.bf16.msra.mxu1 %v3662_v38  ;;  %2543 = vmatpush1.bf16.msra.mxu0 %v3665_v40  ;;  %v3754_v38 = vld [vmem:[#allocation10 + $0x4bc] ss:$24 sps:$4 sm:$0xff]  }
  0xfb   :  { %2487 = vmatprep.subr.bf16.mxu1 %v3670_v41  ;;  %2544 = vmatprep.subr.bf16.mxu0 %v3673_v42  ;;  %v3757_v40 = vld [vmem:[#allocation10 + $0x44] ss:$24 sps:$4 sm:$0xff]   ;;  %v3752_v41 = vld [vmem:[#allocation10 + $0x4b8] ss:$24 sps:$4 sm:$0xff]  }
  0xfc   :  { %v3755_v42 = vld [vmem:[#allocation10 + $0x40] ss:$24 sps:$4 sm:$0xff]  }
  0xfe   :  { %2488 = vmatpush1.bf16.msra.mxu1 %v3668_v43  ;;  %2545 = vmatpush1.bf16.msra.mxu0 %v3671_v45  ;;  %v3760_v43 = vld [vmem:[#allocation10 + $0x4ec] ss:$24 sps:$4 sm:$0xff]  }
  0xff   :  { %2489 = vmatprep.subr.bf16.mxu1 %v3676_v46  ;;  %2546 = vmatprep.subr.bf16.mxu0 %v3679_v47  ;;  %v3763_v45 = vld [vmem:[#allocation10 + $0x74] ss:$24 sps:$4 sm:$0xff]   ;;  %v3758_v46 = vld [vmem:[#allocation10 + $0x4e8] ss:$24 sps:$4 sm:$0xff]  }
 0x100   :  { %v3761_v47 = vld [vmem:[#allocation10 + $0x70] ss:$24 sps:$4 sm:$0xff]  }
 0x102   :  { %2490 = vmatpush1.bf16.msra.mxu1 %v3674_v49  ;;  %2547 = vmatpush1.bf16.msra.mxu0 %v3677_v50  ;;  %v3766_v49 = vld [vmem:[#allocation10 + $0x51c] ss:$24 sps:$4 sm:$0xff]  }
 0x103   :  { %2491 = vmatprep.subr.bf16.mxu1 %v3682_v51  ;;  %2548 = vmatprep.subr.bf16.mxu0 %v3685_v52  ;;  %v3769_v50 = vld [vmem:[#allocation10 + $0xa4] ss:$24 sps:$4 sm:$0xff]   ;;  %v3764_v51 = vld [vmem:[#allocation10 + $0x518] ss:$24 sps:$4 sm:$0xff]  }
 0x104   :  { %v3767_v52 = vld [vmem:[#allocation10 + $0xa0] ss:$24 sps:$4 sm:$0xff]  }
 0x106   :  { %2492 = vmatpush1.bf16.msra.mxu1 %v3680_v53  ;;  %2549 = vmatpush1.bf16.msra.mxu0 %v3683_v54  ;;  %v3772_v53 = vld [vmem:[#allocation10 + $0x54c] ss:$24 sps:$4 sm:$0xff]  }
 0x107   :  { %2493 = vmatprep.subr.bf16.mxu1 %v3688_v55  ;;  %2550 = vmatprep.subr.bf16.mxu0 %v3691_v56  ;;  %v3775_v54 = vld [vmem:[#allocation10 + $0xd4] ss:$24 sps:$4 sm:$0xff]   ;;  %v3770_v55 = vld [vmem:[#allocation10 + $0x548] ss:$24 sps:$4 sm:$0xff]  }
 0x108   :  { %v3778_v56 = vld [vmem:[#allocation10 + $0x57c] ss:$24 sps:$4 sm:$0xff]  }
 0x10a   :  { %2494 = vmatpush1.bf16.msra.mxu1 %v3686_v57  ;;  %2551 = vmatpush1.bf16.msra.mxu0 %v3689_v58  ;;  %v3781_v57 = vld [vmem:[#allocation10 + $0x104] ss:$24 sps:$4 sm:$0xff]   ;;  %v3776_v58 = vld [vmem:[#allocation10 + $0x578] ss:$24 sps:$4 sm:$0xff]  }
 0x10b   :  { %2495 = vmatprep.subr.bf16.mxu1 %v3694_v60  ;;  %2552 = vmatprep.subr.bf16.mxu0 %v3697_v61  ;;  %v3779_v60 = vld [vmem:[#allocation10 + $0x100] ss:$24 sps:$4 sm:$0xff]   ;;  %v3784_v61 = vld [vmem:[#allocation10 + $0x5ac] ss:$24 sps:$4 sm:$0xff]  }
 0x10e   :  { %2496 = vmatpush1.bf16.msra.mxu1 %v3692_v62  ;;  %2553 = vmatpush1.bf16.msra.mxu0 %v3695_v63  ;;  %v3787_v62 = vld [vmem:[#allocation10 + $0x134] ss:$24 sps:$4 sm:$0xff]   ;;  %v3782_v63 = vld [vmem:[#allocation10 + $0x5a8] ss:$24 sps:$4 sm:$0xff]  }
 0x10f   :  { %2497 = vmatprep.subr.bf16.mxu1 %v3700_v0  ;;  %2563 = vmatprep.subr.bf16.mxu0 %v3703_v1  ;;  %v3785_v0 = vld [vmem:[#allocation10 + $0x130] ss:$24 sps:$4 sm:$0xff]   ;;  %v3790_v1 = vld [vmem:[#allocation10 + $0x5dc] ss:$24 sps:$4 sm:$0xff]  }
 0x111   :  { %2555 = vmatmul.mubr.bf16.vlgmr.msra.gmra.mrb[12].mxu0 %v4372_v44 }
 0x112   :  { %2498 = vmatpush1.bf16.msra.mxu1 %v3698_v2  ;;  %2564 = vmatpush1.bf16.msra.mxu0 %v3701_v3  ;;  %v3793_v2 = vld [vmem:[#allocation10 + $0x164] ss:$24 sps:$4 sm:$0xff]   ;;  %v3788_v3 = vld [vmem:[#allocation10 + $0x5d8] ss:$24 sps:$4 sm:$0xff]  }
 0x113   :  { %2499 = vmatprep.subr.bf16.mxu1 %v3706_v4  ;;  %2565 = vmatprep.subr.bf16.mxu0 %v3709_v5  ;;  %v3791_v4 = vld [vmem:[#allocation10 + $0x160] ss:$24 sps:$4 sm:$0xff]   ;;  %v3796_v5 = vld [vmem:[#allocation10 + $0x60c] ss:$24 sps:$4 sm:$0xff]  }
 0x114   :  { %2595 = vmatprep.mubr.bf16.mxu0 %v4376_v11 }
 0x116   :  { %2500 = vmatpush1.bf16.msra.mxu1 %v3704_v6  ;;  %2566 = vmatpush1.bf16.msra.mxu0 %v3707_v7  ;;  %v3799_v6 = vld [vmem:[#allocation10 + $0x194] ss:$24 sps:$4 sm:$0xff]   ;;  %v3794_v7 = vld [vmem:[#allocation10 + $0x608] ss:$24 sps:$4 sm:$0xff]  }
 0x117   :  { %2501 = vmatprep.subr.bf16.mxu1 %v3712_v8  ;;  %2567 = vmatprep.subr.bf16.mxu0 %v3715_v9  ;;  %v3797_v8 = vld [vmem:[#allocation10 + $0x190] ss:$24 sps:$4 sm:$0xff]   ;;  %v3802_v9 = vld [vmem:[#allocation10 + $0x63c] ss:$24 sps:$4 sm:$0xff]  }
 0x11a   :  { %2502 = vmatpush1.bf16.msra.mxu1 %v3710_v10  ;;  %2568 = vmatpush1.bf16.msra.mxu0 %v3713_v12  ;;  %v3805_v10 = vld [vmem:[#allocation10 + $0x1c4] ss:$24 sps:$4 sm:$0xff]   ;;  %v3800_v12 = vld [vmem:[#allocation10 + $0x638] ss:$24 sps:$4 sm:$0xff]  }
 0x11b   :  { %2503 = vmatprep.subr.bf16.mxu1 %v3718_v13  ;;  %2569 = vmatprep.subr.bf16.mxu0 %v3721_v14  ;;  %v3803_v13 = vld [vmem:[#allocation10 + $0x1c0] ss:$24 sps:$4 sm:$0xff]   ;;  %v3808_v14 = vld [vmem:[#allocation10 + $0x66c] ss:$24 sps:$4 sm:$0xff]  }
 0x11e   :  { %2504 = vmatpush1.bf16.msra.mxu1 %v3716_v15  ;;  %2570 = vmatpush1.bf16.msra.mxu0 %v3719_v16  ;;  %v3811_v15 = vld [vmem:[#allocation10 + $0x1f4] ss:$24 sps:$4 sm:$0xff]   ;;  %v3806_v16 = vld [vmem:[#allocation10 + $0x668] ss:$24 sps:$4 sm:$0xff]  }
 0x11f   :  { %2505 = vmatprep.subr.bf16.mxu1 %v3724_v17  ;;  %2571 = vmatprep.subr.bf16.mxu0 %v3727_v19  ;;  %v3809_v17 = vld [vmem:[#allocation10 + $0x1f0] ss:$24 sps:$4 sm:$0xff]   ;;  %v3814_v19 = vld [vmem:[#allocation10 + $0x69c] ss:$24 sps:$4 sm:$0xff]  }
 0x122   :  { %2506 = vmatpush1.bf16.msra.mxu1 %v3722_v20  ;;  %2572 = vmatpush1.bf16.msra.mxu0 %v3725_v21  ;;  %v3817_v20 = vld [vmem:[#allocation10 + $0x224] ss:$24 sps:$4 sm:$0xff]   ;;  %v3812_v21 = vld [vmem:[#allocation10 + $0x698] ss:$24 sps:$4 sm:$0xff]  }
 0x123   :  { %2507 = vmatprep.subr.bf16.mxu1 %v3730_v22  ;;  %2573 = vmatprep.subr.bf16.mxu0 %v3733_v23  ;;  %v3815_v22 = vld [vmem:[#allocation10 + $0x220] ss:$24 sps:$4 sm:$0xff]   ;;  %v3820_v23 = vld [vmem:[#allocation10 + $0x6cc] ss:$24 sps:$4 sm:$0xff]  }
 0x126   :  { %2508 = vmatpush1.bf16.msra.mxu1 %v3728_v24  ;;  %2574 = vmatpush1.bf16.msra.mxu0 %v3731_v25  ;;  %v3823_v24 = vld [vmem:[#allocation10 + $0x254] ss:$24 sps:$4 sm:$0xff]   ;;  %v3818_v25 = vld [vmem:[#allocation10 + $0x6c8] ss:$24 sps:$4 sm:$0xff]  }
 0x127   :  { %2509 = vmatprep.subr.bf16.mxu1 %v3736_v26  ;;  %2575 = vmatprep.subr.bf16.mxu0 %v3739_v27  ;;  %v3821_v26 = vld [vmem:[#allocation10 + $0x250] ss:$24 sps:$4 sm:$0xff]   ;;  %v3826_v27 = vld [vmem:[#allocation10 + $0x6fc] ss:$24 sps:$4 sm:$0xff]  }
 0x12a   :  { %2510 = vmatpush1.bf16.msra.mxu1 %v3734_v28  ;;  %2576 = vmatpush1.bf16.msra.mxu0 %v3737_v29  ;;  %v3829_v28 = vld [vmem:[#allocation10 + $0x284] ss:$24 sps:$4 sm:$0xff]   ;;  %v3824_v29 = vld [vmem:[#allocation10 + $0x6f8] ss:$24 sps:$4 sm:$0xff]  }
 0x12b   :  { %2511 = vmatprep.subr.bf16.mxu1 %v3742_v30  ;;  %2577 = vmatprep.subr.bf16.mxu0 %v3745_v31  ;;  %v3827_v30 = vld [vmem:[#allocation10 + $0x280] ss:$24 sps:$4 sm:$0xff]   ;;  %v3832_v31 = vld [vmem:[#allocation10 + $0x72c] ss:$24 sps:$4 sm:$0xff]  }
 0x12e   :  { %2512 = vmatpush1.bf16.msra.mxu1 %v3740_v32  ;;  %2578 = vmatpush1.bf16.msra.mxu0 %v3743_v33  ;;  %v3835_v32 = vld [vmem:[#allocation10 + $0x2b4] ss:$24 sps:$4 sm:$0xff]  }
 0x12f   :  { %2579 = vmatprep.subr.bf16.mxu0 %v3748_v34  ;;  %2645 = vmatprep.subr.bf16.mxu1 %v3751_v35  ;;  %v3830_v35 = vld [vmem:[#allocation10 + $0x728] ss:$24 sps:$4 sm:$0xff]  }
 0x131   :  { %2514 = vmatmul.mubr.bf16.vlgmr.msra.gmra.mrb[0].mxu1 %v4387_v59 }
 0x132   :  { %2580 = vmatpush1.bf16.msra.mxu0 %v3746_v36  ;;  %2646 = vmatpush1.bf16.msra.mxu1 %v3749_v37  ;;  %v3833_v36 = vld [vmem:[#allocation10 + $0x2b0] ss:$24 sps:$4 sm:$0xff]  }
 0x133   :  { %2581 = vmatprep.subr.bf16.mxu0 %v3754_v38  ;;  %2647 = vmatprep.subr.bf16.mxu1 %v3757_v40 }
 0x134   :  { %2677 = vmatprep.mubr.bf16.mxu1 %v4369_v39  ;;  %v3773_v39 = vld [vmem:[#allocation10 + $0xd0] ss:$24 sps:$4 sm:$0xff]  }
 0x136   :  { %2582 = vmatpush1.bf16.msra.mxu0 %v3752_v41  ;;  %2648 = vmatpush1.bf16.msra.mxu1 %v3755_v42  ;;  %v3838_v41 = vld [vmem:[#allocation10 + $0x75c] ss:$24 sps:$4 sm:$0xff]  }
 0x137   :  { %2583 = vmatprep.subr.bf16.mxu0 %v3760_v43  ;;  %2649 = vmatprep.subr.bf16.mxu1 %v3763_v45  ;;  %v3841_v42 = vld [vmem:[#allocation10 + $0x2e4] ss:$24 sps:$4 sm:$0xff]   ;;  %v3836_v43 = vld [vmem:[#allocation10 + $0x758] ss:$24 sps:$4 sm:$0xff]  }
 0x138   :  { %v3839_v45 = vld [vmem:[#allocation10 + $0x2e0] ss:$24 sps:$4 sm:$0xff]  }
 0x13a   :  { %2584 = vmatpush1.bf16.msra.mxu0 %v3758_v46  ;;  %2650 = vmatpush1.bf16.msra.mxu1 %v3761_v47  ;;  %v3844_v46 = vld [vmem:[#allocation10 + $0x78c] ss:$24 sps:$4 sm:$0xff]  }
 0x13b   :  { %2585 = vmatprep.subr.bf16.mxu0 %v3766_v49  ;;  %2651 = vmatprep.subr.bf16.mxu1 %v3769_v50  ;;  %v3847_v47 = vld [vmem:[#allocation10 + $0x314] ss:$24 sps:$4 sm:$0xff]   ;;  %v3842_v49 = vld [vmem:[#allocation10 + $0x788] ss:$24 sps:$4 sm:$0xff]  }
 0x13c   :  { %v3845_v50 = vld [vmem:[#allocation10 + $0x310] ss:$24 sps:$4 sm:$0xff]  }
 0x13e   :  { %2586 = vmatpush1.bf16.msra.mxu0 %v3764_v51  ;;  %2652 = vmatpush1.bf16.msra.mxu1 %v3767_v52  ;;  %v3850_v51 = vld [vmem:[#allocation10 + $0x7bc] ss:$24 sps:$4 sm:$0xff]  }
 0x13f   :  { %2587 = vmatprep.subr.bf16.mxu0 %v3772_v53  ;;  %2653 = vmatprep.subr.bf16.mxu1 %v3775_v54  ;;  %v3853_v52 = vld [vmem:[#allocation10 + $0x344] ss:$24 sps:$4 sm:$0xff]   ;;  %v3848_v53 = vld [vmem:[#allocation10 + $0x7b8] ss:$24 sps:$4 sm:$0xff]  }
 0x140   :  { %v3851_v54 = vld [vmem:[#allocation10 + $0x340] ss:$24 sps:$4 sm:$0xff]  }
 0x142   :  { %2588 = vmatpush1.bf16.msra.mxu0 %v3770_v55  ;;  %2654 = vmatpush1.bf16.msra.mxu1 %v3773_v39  ;;  %v3856_v55 = vld [vmem:[#allocation10 + $0x7ec] ss:$24 sps:$4 sm:$0xff]  }
 0x143   :  { %2589 = vmatprep.subr.bf16.mxu0 %v3778_v56  ;;  %2655 = vmatprep.subr.bf16.mxu1 %v3781_v57  ;;  %v3859_v39 = vld [vmem:[#allocation10 + $0x374] ss:$24 sps:$4 sm:$0xff]   ;;  %v3854_v56 = vld [vmem:[#allocation10 + $0x7e8] ss:$24 sps:$4 sm:$0xff]  }
 0x144   :  { %v3857_v57 = vld [vmem:[#allocation10 + $0x370] ss:$24 sps:$4 sm:$0xff]  }
 0x146   :  { %2590 = vmatpush1.bf16.msra.mxu0 %v3776_v58  ;;  %2656 = vmatpush1.bf16.msra.mxu1 %v3779_v60  ;;  %v3862_v58 = vld [vmem:[#allocation10 + $0x81c] ss:$24 sps:$4 sm:$0xff]  }
 0x147   :  { %2591 = vmatprep.subr.bf16.mxu0 %v3784_v61  ;;  %2657 = vmatprep.subr.bf16.mxu1 %v3787_v62  ;;  %v3865_v60 = vld [vmem:[#allocation10 + $0x3a4] ss:$24 sps:$4 sm:$0xff]   ;;  %v3863_v61 = vld [vmem:[#allocation10 + $0x3a0] ss:$24 sps:$4 sm:$0xff]  }
 0x148   :  { %v3868_v62 = vld [vmem:[#allocation10 + $0x84c] ss:$24 sps:$4 sm:$0xff]  }
 0x14a   :  { %2592 = vmatpush1.bf16.msra.mxu0 %v3782_v63  ;;  %2658 = vmatpush1.bf16.msra.mxu1 %v3785_v0  ;;  %v3871_v63 = vld [vmem:[#allocation10 + $0x3d4] ss:$24 sps:$4 sm:$0xff]   ;;  %v3866_v0 = vld [vmem:[#allocation10 + $0x848] ss:$24 sps:$4 sm:$0xff]  }
 0x14b   :  { %2593 = vmatprep.subr.bf16.mxu0 %v3790_v1  ;;  %2659 = vmatprep.subr.bf16.mxu1 %v3793_v2  ;;  %v3874_v1 = vld [vmem:[#allocation10 + $0x87c] ss:$24 sps:$4 sm:$0xff]  }
 0x14c   :  { %v3877_v2 = vld [vmem:[#allocation10 + $0x404] ss:$24 sps:$4 sm:$0xff]  }
 0x14e   :  { %2594 = vmatpush1.bf16.msra.mxu0 %v3788_v3  ;;  %2660 = vmatpush1.bf16.msra.mxu1 %v3791_v4  ;;  %v3872_v3 = vld [vmem:[#allocation10 + $0x878] ss:$24 sps:$4 sm:$0xff]  }
 0x14f   :  { %2604 = vmatprep.subr.bf16.mxu0 %v3796_v5  ;;  %2661 = vmatprep.subr.bf16.mxu1 %v3799_v6  ;;  %v3875_v4 = vld [vmem:[#allocation10 + $0x400] ss:$24 sps:$4 sm:$0xff]   ;;  %v4403_v5 = vld [vmem:[#allocation8] ss:$0 sm:$0xff]  ;;  %v3880_v6 = vld [vmem:[#allocation10 + $0x8ac] ss:$24 sps:$4 sm:$0xff]  }
 0x151   :  { %2596 = vmatmul.mubr.bf16.vlgmr.msra.gmra.mrb[12].mxu0 %v4379_v18 }
 0x152   :  { %2605 = vmatpush1.bf16.msra.mxu0 %v3794_v7  ;;  %2662 = vmatpush1.bf16.msra.mxu1 %v3797_v8  ;;  %v3883_v7 = vld [vmem:[#allocation10 + $0x434] ss:$24 sps:$4 sm:$0xff]  }
 0x153   :  { %2606 = vmatprep.subr.bf16.mxu0 %v3802_v9  ;;  %2663 = vmatprep.subr.bf16.mxu1 %v3805_v10  ;;  %v2781_v10 = vld [vmem:[#allocation5 + $0x8] sm:$0xff] }
 0x154   :  { %2636 = vmatprep.mubr.bf16.mxu0 %v4384_v48 }
 0x156   :  { %2607 = vmatpush1.bf16.msra.mxu0 %v3800_v12  ;;  %2664 = vmatpush1.bf16.msra.mxu1 %v3803_v13 }
 0x157   :  { %2608 = vmatprep.subr.bf16.mxu0 %v3808_v14  ;;  %2665 = vmatprep.subr.bf16.mxu1 %v3811_v15  ;;  %v3878_v14 = vld [vmem:[#allocation10 + $0x8a8] ss:$24 sps:$4 sm:$0xff]  }
 0x158   :  { %v3881_v15 = vld [vmem:[#allocation10 + $0x430] ss:$24 sps:$4 sm:$0xff]  }
 0x15a   :  { %2609 = vmatpush1.bf16.msra.mxu0 %v3806_v16  ;;  %2666 = vmatpush1.bf16.msra.mxu1 %v3809_v17 }
 0x15b   :  { %2610 = vmatprep.subr.bf16.mxu0 %v3814_v19  ;;  %2667 = vmatprep.subr.bf16.mxu1 %v3817_v20  ;;  %v3886_v19 = vld [vmem:[#allocation10 + $0x8dc] ss:$24 sps:$4 sm:$0xff]  }
 0x15c   :  { %v3889_v20 = vld [vmem:[#allocation10 + $0x464] ss:$24 sps:$4 sm:$0xff]  }
 0x15e   :  { %2611 = vmatpush1.bf16.msra.mxu0 %v3812_v21  ;;  %2668 = vmatpush1.bf16.msra.mxu1 %v3815_v22  ;;  %v2787_v22 = vmax.f32 %v2781_v10, 0.0  ;;  %v3989_v10 = vld [vmem:[#allocation7 + $0x38] sm:$0xff]  }
 0x15f   :  { %2612 = vmatprep.subr.bf16.mxu0 %v3820_v23  ;;  %2669 = vmatprep.subr.bf16.mxu1 %v3823_v24  ;;  %v3884_v23 = vld [vmem:[#allocation10 + $0x8d8] ss:$24 sps:$4 sm:$0xff]  }
 0x160   :  { %v3887_v24 = vld [vmem:[#allocation10 + $0x460] ss:$24 sps:$4 sm:$0xff]  }
 0x162   :  { %2613 = vmatpush1.bf16.msra.mxu0 %v3818_v25  ;;  %2670 = vmatpush1.bf16.msra.mxu1 %v3821_v26  ;;  %v3892_v25 = vld [vmem:[#allocation10 + $0x494] ss:$24 sps:$4 sm:$0xff]   ;;  %v2793_v26 = vmin.f32 %v2787_v22, 1.0  ;;  %v3920_v22 = vld [vmem:[#allocation10 + $0x670] ss:$24 sps:$4 sm:$0xff]  }
 0x163   :  { %2614 = vmatprep.subr.bf16.mxu0 %v3826_v27  ;;  %2671 = vmatprep.subr.bf16.mxu1 %v3829_v28  ;;  %v3890_v27 = vld [vmem:[#allocation10 + $0x490] ss:$24 sps:$4 sm:$0xff]   ;;  %v3974_v28 = vld [vmem:[#allocation7 + $0x40] sm:$0xff]  }
 0x164   :  { %v3323_v33 = vpop.f32.mrb[0].mxu0 }
 0x165   :  { %v3324_v34 = vpop.f32.mrb[1].mxu0 }
 0x166   :  { %2615 = vmatpush1.bf16.msra.mxu0 %v3824_v29  ;;  %2672 = vmatpush1.bf16.msra.mxu1 %v3827_v30  ;;  %v4399_v37 = vadd.f32 %v3324_v34, %v3323_v33  ;;  %v3326_v38 = vpop.f32.mrb[2].mxu0  ;;  %v3895_v29 = vld [vmem:[#allocation10 + $0x4c4] ss:$24 sps:$4 sm:$0xff]   ;;  %v2799_v30 = vpack.c.bf16 %v2793_v26, %v2793_v26  ;;  %v3898_v34 = vld [vmem:[#allocation10 + $0x4f4] ss:$24 sps:$4 sm:$0xff]  }
 0x167   :  { %2616 = vmatprep.subr.bf16.mxu0 %v3832_v31  ;;  %2673 = vmatprep.subr.bf16.mxu1 %v3835_v32  ;;  %v3327_v40 = vpop.f32.mrb[3].mxu0  ;;  %v3975_v31 = vld [vmem:[#allocation7] sm:$0xff]   ;;  %v3976_v33 = vld [vmem:[#allocation7 + $0x48] sm:$0xff]   ;;  %v3996_v26 = vld [vmem:[#allocation7 + $0xd8] sm:$0xff]  }
 0x168   :  { %v553_v12 = vadd.f32 %v4399_v37, %v4403_v5  ;;  %v3893_v32 = vld [vmem:[#allocation10 + $0x4c0] ss:$24 sps:$4 sm:$0xff]   ;;  %v3978_v37 = vld [vmem:[#allocation7 + $0x50] sm:$0xff]   ;;  %v3901_v38 = vld [vmem:[#allocation10 + $0x524] ss:$24 sps:$4 sm:$0xff]  }
 0x169   :  { %v3979_v40 = vld [vmem:[#allocation7 + $0x10] sm:$0xff]  }
 0x16a   :  { %2617 = vmatpush1.bf16.msra.mxu0 %v3830_v35  ;;  %2674 = vmatpush1.bf16.msra.mxu1 %v3833_v36  ;;  %v3977_v35 = vld [vmem:[#allocation7 + $0x8] sm:$0xff]  }
 0x16b   :  { %2618 = vmatprep.subr.bf16.mxu0 %v3838_v41  ;;  %2675 = vmatprep.subr.bf16.mxu1 %v3841_v42  ;;  %v3896_v36 = vld [vmem:[#allocation10 + $0x4f0] ss:$24 sps:$4 sm:$0xff]   ;;  %v3899_v41 = vld [vmem:[#allocation10 + $0x520] ss:$24 sps:$4 sm:$0xff]  }
 0x16c   :  { %v3980_v42 = vld [vmem:[#allocation7 + $0x58] sm:$0xff]  }
 0x16e   :  { %2619 = vmatpush1.bf16.msra.mxu0 %v3836_v43  ;;  %2676 = vmatpush1.bf16.msra.mxu1 %v3839_v45  ;;  %v3904_v43 = vld [vmem:[#allocation10 + $0x554] ss:$24 sps:$4 sm:$0xff]  }
 0x16f   :  { %2620 = vmatprep.subr.bf16.mxu0 %v3844_v46  ;;  %2686 = vmatprep.subr.bf16.mxu1 %v3847_v47  ;;  %v3981_v45 = vld [vmem:[#allocation7 + $0x18] sm:$0xff]   ;;  %v3902_v46 = vld [vmem:[#allocation10 + $0x550] ss:$24 sps:$4 sm:$0xff]   ;;  %v3982_v47 = vld [vmem:[#allocation7 + $0x60] sm:$0xff]  }
 0x171   :  { %2678 = vmatmul.mubr.bf16.vlgmr.msra.gmra.mrb[4].mxu1 %v4372_v44  ;;  %v3860_v44 = vld [vmem:[#allocation10 + $0x818] ss:$24 sps:$4 sm:$0xff]  }
 0x172   :  { %2621 = vmatpush1.bf16.msra.mxu0 %v3842_v49  ;;  %2687 = vmatpush1.bf16.msra.mxu1 %v3845_v50  ;;  %v3907_v49 = vld [vmem:[#allocation10 + $0x584] ss:$24 sps:$4 sm:$0xff]  }
 0x173   :  { %2622 = vmatprep.subr.bf16.mxu0 %v3850_v51  ;;  %2688 = vmatprep.subr.bf16.mxu1 %v3853_v52  ;;  %v3983_v50 = vld [vmem:[#allocation7 + $0x20] sm:$0xff]   ;;  %v2780_v52 = vld [vmem:[#allocation5] sm:$0xff] }
 0x174   :  { %2718 = vmatprep.mubr.bf16.mxu1 %v4376_v11  ;;  %v3869_v11 = vld [vmem:[#allocation10 + $0x3d0] ss:$24 sps:$4 sm:$0xff]   ;;  %v3905_v51 = vld [vmem:[#allocation10 + $0x580] ss:$24 sps:$4 sm:$0xff]  }
 0x176   :  { %2623 = vmatpush1.bf16.msra.mxu0 %v3848_v53  ;;  %2689 = vmatpush1.bf16.msra.mxu1 %v3851_v54  ;;  %v3984_v53 = vld [vmem:[#allocation7 + $0x68] sm:$0xff]  }
 0x177   :  { %2624 = vmatprep.subr.bf16.mxu0 %v3856_v55  ;;  %2690 = vmatprep.subr.bf16.mxu1 %v3859_v39  ;;  %v3910_v54 = vld [vmem:[#allocation10 + $0x5b4] ss:$24 sps:$4 sm:$0xff]  }
 0x17a   :  { %2625 = vmatpush1.bf16.msra.mxu0 %v3854_v56  ;;  %2691 = vmatpush1.bf16.msra.mxu1 %v3857_v57  ;;  %v2786_v56 = vmax.f32 %v2780_v52, 0.0  ;;  %v2783_v57 = vld [vmem:[#allocation5 + $0x18] sm:$0xff] }
 0x17b   :  { %2626 = vmatprep.subr.bf16.mxu0 %v3862_v58  ;;  %2692 = vmatprep.subr.bf16.mxu1 %v3865_v60  ;;  %v3985_v60 = vld [vmem:[#allocation7 + $0x28] sm:$0xff]  }
 0x17e   :  { %2627 = vmatpush1.bf16.msra.mxu0 %v3860_v44  ;;  %2693 = vmatpush1.bf16.msra.mxu1 %v3863_v61  ;;  %v3908_v44 = vld [vmem:[#allocation10 + $0x5b0] ss:$24 sps:$4 sm:$0xff]  }
 0x17f   :  { %2628 = vmatprep.subr.bf16.mxu0 %v3868_v62  ;;  %2694 = vmatprep.subr.bf16.mxu1 %v3871_v63  ;;  %v3986_v62 = vld [vmem:[#allocation7 + $0x70] sm:$0xff]  }
 0x182   :  { %2629 = vmatpush1.bf16.msra.mxu0 %v3866_v0  ;;  %2695 = vmatpush1.bf16.msra.mxu1 %v3869_v11  ;;  %v3913_v0 = vld [vmem:[#allocation10 + $0x5e4] ss:$24 sps:$4 sm:$0xff]  }
 0x183   :  { %2630 = vmatprep.subr.bf16.mxu0 %v3874_v1  ;;  %2696 = vmatprep.subr.bf16.mxu1 %v3877_v2  ;;  %v2789_v1 = vmax.f32 %v2783_v57, 0.0  ;;  %v2792_v2 = vmin.f32 %v2786_v56, 1.0  ;;  %v4007_v57 = vld [vmem:[#allocation7 + $0x100] sm:$0xff]  }
 0x184   :  { %v3345_v8 = vpop.f32.mrb[4].mxu0 }
 0x185   :  { %v3346_v9 = vpop.f32.mrb[5].mxu0 }
 0x186   :  { %v3347_v13 = vadd.f32 %v3346_v9, %v3345_v8  ;;  %2631 = vmatpush1.bf16.msra.mxu0 %v3872_v3  ;;  %2697 = vmatpush1.bf16.msra.mxu1 %v3875_v4  ;;  %v3348_v16 = vpop.f32.mrb[6].mxu0  ;;  %v3987_v3 = vld [vmem:[#allocation7 + $0x30] sm:$0xff]   ;;  %v3911_v4 = vld [vmem:[#allocation10 + $0x5e0] ss:$24 sps:$4 sm:$0xff]   ;;  %v2795_v8 = vmin.f32 %v2789_v1, 1.0  ;;  %v2798_v9 = vpack.c.bf16 %v2792_v2, %v2792_v2 }
 0x187   :  { %2632 = vmatprep.subr.bf16.mxu0 %v3880_v6  ;;  %2698 = vmatprep.subr.bf16.mxu1 %v3883_v7  ;;  %v3349_v17 = vpop.f32.mrb[7].mxu0  ;;  %v3988_v6 = vld [vmem:[#allocation7 + $0x78] sm:$0xff]   ;;  %v3991_v16 = vld [vmem:[#allocation7 + $0x80] sm:$0xff]  }
 0x188   :  { %v4407_v21 = vadd.f32 %v3347_v13, %v553_v12  ;;  %v3916_v7 = vld [vmem:[#allocation10 + $0x614] ss:$24 sps:$4 sm:$0xff]   ;;  %v3914_v12 = vld [vmem:[#allocation10 + $0x610] ss:$24 sps:$4 sm:$0xff]   ;;  %v3990_v13 = vld [vmem:[#allocation7 + $0xc0] sm:$0xff]  }
 0x189   :  { %v3917_v17 = vld [vmem:[#allocation10 + $0x640] ss:$24 sps:$4 sm:$0xff]  }
 0x18a   :  { %2633 = vmatpush1.bf16.msra.mxu0 %v3878_v14  ;;  %2699 = vmatpush1.bf16.msra.mxu1 %v3881_v15  ;;  %v3919_v14 = vld [vmem:[#allocation10 + $0x644] ss:$24 sps:$4 sm:$0xff]   ;;  %v2801_v15 = vpack.c.bf16 %v2795_v8, %v2795_v8  ;;  %v3947_v1 = vld [vmem:[#allocation10 + $0x820] ss:$24 sps:$4 sm:$0xff]  }
 0x18b   :  { %2634 = vmatprep.subr.bf16.mxu0 %v3886_v19  ;;  %2700 = vmatprep.subr.bf16.mxu1 %v3889_v20  ;;  %v3992_v19 = vld [vmem:[#allocation7 + $0xc8] sm:$0xff]   ;;  %v4012_v2 = vld [vmem:[#allocation7 + $0x158] sm:$0xff]  }
 0x18c   :  { %v3922_v20 = vld [vmem:[#allocation10 + $0x674] ss:$24 sps:$4 sm:$0xff]   ;;  %v3955_v8 = vld [vmem:[#allocation10 + $0x884] ss:$24 sps:$4 sm:$0xff]  }
 0x18e   :  { %2635 = vmatpush1.bf16.msra.mxu0 %v3884_v23  ;;  %2701 = vmatpush1.bf16.msra.mxu1 %v3887_v24  ;;  %v3994_v23 = vld [vmem:[#allocation7 + $0xd0] sm:$0xff]  }
 0x18f   :  { %2702 = vmatprep.subr.bf16.mxu1 %v3892_v25  ;;  %3373 = vmatprep.subr.bf16.mxu0 %v3974_v28  ;;  %v3995_v24 = vld [vmem:[#allocation7 + $0x90] sm:$0xff]   ;;  %v3923_v25 = vld [vmem:[#allocation10 + $0x6a0] ss:$24 sps:$4 sm:$0xff]  }
 0x190   :  { %v3997_v28 = vld [vmem:[#allocation7 + $0x98] sm:$0xff]  }
 0x191   :  { %2637 = vmatmul.mubr.bf16.vlgmr.msra.gmra.mrb[12].mxu0 %v4387_v59 }
 0x192   :  { %2703 = vmatpush1.bf16.msra.mxu1 %v3890_v27  ;;  %3374 = vmatpush3.bf16.msra.mxu0 %v3975_v31  ;;  %v3928_v27 = vld [vmem:[#allocation10 + $0x6d4] ss:$24 sps:$4 sm:$0xff]   ;;  %v3999_v31 = vld [vmem:[#allocation7 + $0xa0] sm:$0xff]  }
 0x193   :  { %2704 = vmatprep.subr.bf16.mxu1 %v3895_v29  ;;  %3375 = vmatprep.subr.bf16.mxu0 %v3976_v33  ;;  %v3998_v29 = vld [vmem:[#allocation7 + $0xe0] sm:$0xff]  }
 0x194   :  { %2836 = vmatprep.mubr.bf16.mxu0 %v2799_v30  ;;  %v3931_v30 = vld [vmem:[#allocation10 + $0x704] ss:$24 sps:$4 sm:$0xff]  }
 0x195   :  { %v2782_v33 = vld [vmem:[#allocation5 + $0x10] sm:$0xff] }
 0x196   :  { %2705 = vmatpush1.bf16.msra.mxu1 %v3893_v32  ;;  %3376 = vmatpush3.bf16.msra.mxu0 %v3977_v35  ;;  %v3929_v32 = vld [vmem:[#allocation10 + $0x700] ss:$24 sps:$4 sm:$0xff]   ;;  %v3934_v35 = vld [vmem:[#allocation10 + $0x734] ss:$24 sps:$4 sm:$0xff]  }
 0x197   :  { %2706 = vmatprep.subr.bf16.mxu1 %v3898_v34  ;;  %3377 = vmatprep.subr.bf16.mxu0 %v3978_v37  ;;  %v4000_v34 = vld [vmem:[#allocation7 + $0xe8] sm:$0xff]   ;;  %v2785_v37 = vld [vmem:[#allocation5 + $0x28] sm:$0xff] }
 0x19a   :  { %2707 = vmatpush1.bf16.msra.mxu1 %v3896_v36  ;;  %3378 = vmatpush3.bf16.msra.mxu0 %v3979_v40  ;;  %v2788_v36 = vmax.f32 %v2782_v33, 0.0  ;;  %v3932_v40 = vld [vmem:[#allocation10 + $0x730] ss:$24 sps:$4 sm:$0xff]  }
 0x19b   :  { %2708 = vmatprep.subr.bf16.mxu1 %v3901_v38  ;;  %3379 = vmatprep.subr.bf16.mxu0 %v3980_v42  ;;  %v4001_v38 = vld [vmem:[#allocation7 + $0xa8] sm:$0xff]  }
 0x19c   :  { %v3937_v42 = vld [vmem:[#allocation10 + $0x764] ss:$24 sps:$4 sm:$0xff]  }
 0x19e   :  { %2709 = vmatpush1.bf16.msra.mxu1 %v3899_v41  ;;  %3380 = vmatpush3.bf16.msra.mxu0 %v3981_v45  ;;  %v4002_v41 = vld [vmem:[#allocation7 + $0xf0] sm:$0xff]   ;;  %v2794_v45 = vmin.f32 %v2788_v36, 1.0 }
 0x19f   :  { %2710 = vmatprep.subr.bf16.mxu1 %v3904_v43  ;;  %3381 = vmatprep.subr.bf16.mxu0 %v3982_v47  ;;  %v2791_v43 = vmax.f32 %v2785_v37, 0.0  ;;  %v3935_v47 = vld [vmem:[#allocation10 + $0x760] ss:$24 sps:$4 sm:$0xff]  }
 0x1a0   :  { %v2800_v52 = vpack.c.bf16 %v2794_v45, %v2794_v45 }
 0x1a2   :  { %2711 = vmatpush1.bf16.msra.mxu1 %v3902_v46  ;;  %3382 = vmatpush3.bf16.msra.mxu0 %v3983_v50  ;;  %v4003_v46 = vld [vmem:[#allocation7 + $0xb0] sm:$0xff]  }
 0x1a3   :  { %2712 = vmatprep.subr.bf16.mxu1 %v3907_v49  ;;  %3383 = vmatprep.subr.bf16.mxu0 %v3984_v53  ;;  %v4004_v49 = vld [vmem:[#allocation7 + $0xf8] sm:$0xff]  }
 0x1a4   :  { %v3367_v55 = vpop.f32.mrb[8].mxu0  ;;  %v3940_v50 = vld [vmem:[#allocation10 + $0x794] ss:$24 sps:$4 sm:$0xff]  }
 0x1a5   :  { %v3368_v39 = vpop.f32.mrb[9].mxu0  ;;  %v4005_v53 = vld [vmem:[#allocation7 + $0xb8] sm:$0xff]  }
 0x1a6   :  { %v3369_v58 = vadd.f32 %v3368_v39, %v3367_v55  ;;  %2713 = vmatpush1.bf16.msra.mxu1 %v3905_v51  ;;  %3384 = vmatpush3.bf16.msra.mxu0 %v3985_v60  ;;  %v3370_v61 = vpop.f32.mrb[10].mxu0  ;;  %v2797_v51 = vmin.f32 %v2791_v43, 1.0  ;;  %v4006_v55 = vld [vmem:[#allocation7 + $0x140] sm:$0xff]   ;;  %v4008_v60 = vld [vmem:[#allocation7 + $0x148] sm:$0xff]  }
 0x1a7   :  { %2714 = vmatprep.subr.bf16.mxu1 %v3910_v54  ;;  %3385 = vmatprep.subr.bf16.mxu0 %v3986_v62  ;;  %v3371_v63 = vpop.f32.mrb[11].mxu0  ;;  %v3938_v54 = vld [vmem:[#allocation10 + $0x790] ss:$24 sps:$4 sm:$0xff]   ;;  %v3943_v39 = vld [vmem:[#allocation10 + $0x7c4] ss:$24 sps:$4 sm:$0xff]  }
 0x1a8   :  { %v633_v11 = vadd.f32 %v3369_v58, %v4407_v21  ;;  %v3993_v21 = vld [vmem:[#allocation7 + $0x88] sm:$0xff]   ;;  %v2803_v56 = vpack.c.bf16 %v2797_v51, %v2797_v51  ;;  %v3941_v58 = vld [vmem:[#allocation10 + $0x7c0] ss:$24 sps:$4 sm:$0xff]   ;;  %v4010_v63 = vld [vmem:[#allocation7 + $0x150] sm:$0xff]  }
 0x1a9   :  { %v4009_v61 = vld [vmem:[#allocation7 + $0x108] sm:$0xff]  }
 0x1aa   :  { %638 = vst [vmem:[#allocation13] sm:$0xff] %v633_v11  ;;  %2715 = vmatpush1.bf16.msra.mxu1 %v3908_v44  ;;  %3386 = vmatpush3.bf16.msra.mxu0 %v3987_v3  ;;  %v3946_v44 = vld [vmem:[#allocation10 + $0x7f4] ss:$24 sps:$4 sm:$0xff]   ;;  %v3944_v62 = vld [vmem:[#allocation10 + $0x7f0] ss:$24 sps:$4 sm:$0xff]  }
 0x1ab   :  { %2716 = vmatprep.subr.bf16.mxu1 %v3913_v0  ;;  %3387 = vmatprep.subr.bf16.mxu0 %v3988_v6  ;;  %v3949_v0 = vld [vmem:[#allocation10 + $0x824] ss:$24 sps:$4 sm:$0xff]   ;;  %v4011_v11 = vld [vmem:[#allocation7 + $0x110] sm:$0xff]  }
 0x1ac   :  { %v3952_v3 = vld [vmem:[#allocation10 + $0x854] ss:$24 sps:$4 sm:$0xff]   ;;  %v3950_v6 = vld [vmem:[#allocation10 + $0x850] ss:$24 sps:$4 sm:$0xff]  }
 0x1ae   :  { %2717 = vmatpush1.bf16.msra.mxu1 %v3911_v4  ;;  %3388 = vmatpush3.bf16.msra.mxu0 %v3989_v10  ;;  %v4013_v4 = vld [vmem:[#allocation7 + $0x118] sm:$0xff]  }
 0x1af   :  { %2727 = vmatprep.subr.bf16.mxu1 %v3916_v7  ;;  %3395 = vmatprep.subr.bf16.mxu0 %v3990_v13  ;;  %v4014_v7 = vld [vmem:[#allocation7 + $0x160] sm:$0xff]   ;;  %v4016_v13 = vld [vmem:[#allocation7 + $0x168] sm:$0xff]  }
 0x1b0   :  { %v3953_v10 = vld [vmem:[#allocation10 + $0x880] ss:$24 sps:$4 sm:$0xff]  }
 0x1b1   :  { %2719 = vmatmul.mubr.bf16.vlgmr.msra.gmra.mrb[4].mxu1 %v4379_v18  ;;  %2837 = vmatmul.mubr.bf16.vlgmr.msra.gmra.mrb[16].mxu0 %v2798_v9  ;;  %v3925_v18 = vld [vmem:[#allocation10 + $0x6a4] ss:$24 sps:$4 sm:$0xff]  }
 0x1b2   :  { %2728 = vmatpush1.bf16.msra.mxu1 %v3914_v12  ;;  %3396 = vmatpush3.bf16.msra.mxu0 %v3991_v16  ;;  %v4015_v9 = vld [vmem:[#allocation7 + $0x120] sm:$0xff]   ;;  %v2784_v12 = vld [vmem:[#allocation5 + $0x20] sm:$0xff]  ;;  %v4017_v16 = vld [vmem:[#allocation7 + $0x128] sm:$0xff]  }
 0x1b3   :  { %2729 = vmatprep.subr.bf16.mxu1 %v3919_v14  ;;  %3397 = vmatprep.subr.bf16.mxu0 %v3992_v19  ;;  %v3958_v14 = vld [vmem:[#allocation10 + $0x8b4] ss:$24 sps:$4 sm:$0xff]  }
 0x1b4   :  { %2876 = vmatprep.mubr.bf16.mxu0 %v2801_v15  ;;  %2759 = vmatprep.mubr.bf16.mxu1 %v4384_v48  ;;  %v3926_v48 = vld [vmem:[#allocation10 + $0x6d0] ss:$24 sps:$4 sm:$0xff]   ;;  %v2790_v15 = vmax.f32 %v2784_v12, 0.0 }
 0x1b5   :  { %v4018_v19 = vld [vmem:[#allocation7 + $0x170] sm:$0xff]  }
 0x1b6   :  { %2730 = vmatpush1.bf16.msra.mxu1 %v3917_v17  ;;  %3398 = vmatpush3.bf16.msra.mxu0 %v3993_v21  ;;  %v3956_v17 = vld [vmem:[#allocation10 + $0x8b0] ss:$24 sps:$4 sm:$0xff]   ;;  %v2796_v21 = vmin.f32 %v2790_v15, 1.0 }
 0x1b7   :  { %2731 = vmatprep.subr.bf16.mxu1 %v3922_v20  ;;  %3399 = vmatprep.subr.bf16.mxu0 %v3994_v23  ;;  %v3961_v20 = vld [vmem:[#allocation10 + $0x8e4] ss:$24 sps:$4 sm:$0xff]   ;;  %v3959_v23 = vld [vmem:[#allocation10 + $0x8e0] ss:$24 sps:$4 sm:$0xff]  }
 0x1ba   :  { %2732 = vmatpush1.bf16.msra.mxu1 %v3920_v22  ;;  %3400 = vmatpush3.bf16.msra.mxu0 %v3995_v24  ;;  %v4019_v22 = vld [vmem:[#allocation7 + $0x130] sm:$0xff]   ;;  %v2802_v24 = vpack.c.bf16 %v2796_v21, %v2796_v21 }
 0x1bb   :  { %2733 = vmatprep.subr.bf16.mxu1 %v3925_v18  ;;  %3401 = vmatprep.subr.bf16.mxu0 %v3996_v26  ;;  %v4020_v18 = vld [vmem:[#allocation7 + $0x178] sm:$0xff]   ;;  %v929_v26 = vlaneseq }
 0x1be   :  { %2734 = vmatpush1.bf16.msra.mxu1 %v3923_v25  ;;  %3402 = vmatpush3.bf16.msra.mxu0 %v3997_v28  ;;  %v4021_v25 = vld [vmem:[#allocation7 + $0x138] sm:$0xff]  }
 0x1bf   :  { %2735 = vmatprep.subr.bf16.mxu1 %v3928_v27  ;;  %3403 = vmatprep.subr.bf16.mxu0 %v3998_v29  ;;  %v4414_v27 = vshrl.u32 %v929_v26, 7 }
 0x1c1   :  { %v931_v28 = vsub.s32 0, %v4414_v27  ;;  %v935_v29 = vsub.s32 1, %v4414_v27 }
 0x1c2   :  { %2736 = vmatpush1.bf16.msra.mxu1 %v3926_v48  ;;  %3404 = vmatpush3.bf16.msra.mxu0 %v3999_v31  ;;  %v4417_v48 = vld [vmem:[#allocation11] sm:$0x3f] }
 0x1c3   :  { %2737 = vmatprep.subr.bf16.mxu1 %v3931_v30  ;;  %3405 = vmatprep.subr.bf16.mxu0 %v4000_v34  ;;  %v932_v30 = vrot.slane %v4417_v48, %v931_v28  ;;  %v936_v31 = vrot.slane %v4417_v48, %v935_v29 }
 0x1c6   :  { %2738 = vmatpush1.bf16.msra.mxu1 %v3929_v32  ;;  %3406 = vmatpush3.bf16.msra.mxu0 %v4001_v38 }
 0x1c7   :  { %2739 = vmatprep.subr.bf16.mxu1 %v3934_v35  ;;  %3407 = vmatprep.subr.bf16.mxu0 %v4002_v41 }
 0x1ca   :  { %2740 = vmatpush1.bf16.msra.mxu1 %v3932_v40  ;;  %3408 = vmatpush3.bf16.msra.mxu0 %v4003_v46 }
 0x1cb   :  { %2741 = vmatprep.subr.bf16.mxu1 %v3937_v42  ;;  %3409 = vmatprep.subr.bf16.mxu0 %v4004_v49 }
 0x1ce   :  { %2742 = vmatpush1.bf16.msra.mxu1 %v3935_v47  ;;  %3410 = vmatpush3.bf16.msra.mxu0 %v4005_v53 }
 0x1cf   :  { %2743 = vmatprep.subr.bf16.mxu1 %v3940_v50  ;;  %3417 = vmatprep.subr.bf16.mxu0 %v4006_v55 }
 0x1d1   :  { %2877 = vmatmul.mubr.bf16.vlgmr.msra.gmra.mrb[20].mxu0 %v2800_v52 }
 0x1d2   :  { %2744 = vmatpush1.bf16.msra.mxu1 %v3938_v54  ;;  %3418 = vmatpush3.bf16.msra.mxu0 %v4007_v57 }
 0x1d3   :  { %2745 = vmatprep.subr.bf16.mxu1 %v3943_v39  ;;  %3419 = vmatprep.subr.bf16.mxu0 %v4008_v60 }
 0x1d4   :  { %2916 = vmatprep.mubr.bf16.mxu0 %v2803_v56 }
 0x1d6   :  { %2746 = vmatpush1.bf16.msra.mxu1 %v3941_v58  ;;  %3420 = vmatpush3.bf16.msra.mxu0 %v4009_v61 }
 0x1d7   :  { %2747 = vmatprep.subr.bf16.mxu1 %v3946_v44  ;;  %3421 = vmatprep.subr.bf16.mxu0 %v4010_v63 }
 0x1da   :  { %2748 = vmatpush1.bf16.msra.mxu1 %v3944_v62  ;;  %3422 = vmatpush3.bf16.msra.mxu0 %v4011_v11 }
 0x1db   :  { %2749 = vmatprep.subr.bf16.mxu1 %v3949_v0  ;;  %3423 = vmatprep.subr.bf16.mxu0 %v4012_v2 }
 0x1de   :  { %2750 = vmatpush1.bf16.msra.mxu1 %v3947_v1  ;;  %3424 = vmatpush3.bf16.msra.mxu0 %v4013_v4 }
 0x1df   :  { %2751 = vmatprep.subr.bf16.mxu1 %v3952_v3  ;;  %3425 = vmatprep.subr.bf16.mxu0 %v4014_v7 }
 0x1e2   :  { %2752 = vmatpush1.bf16.msra.mxu1 %v3950_v6  ;;  %3426 = vmatpush3.bf16.msra.mxu0 %v4015_v9 }
 0x1e3   :  { %2753 = vmatprep.subr.bf16.mxu1 %v3955_v8  ;;  %3427 = vmatprep.subr.bf16.mxu0 %v4016_v13 }
 0x1e6   :  { %2754 = vmatpush1.bf16.msra.mxu1 %v3953_v10  ;;  %3428 = vmatpush3.bf16.msra.mxu0 %v4017_v16 }
 0x1e7   :  { %2755 = vmatprep.subr.bf16.mxu1 %v3958_v14  ;;  %3429 = vmatprep.subr.bf16.mxu0 %v4018_v19 }
 0x1ea   :  { %2756 = vmatpush1.bf16.msra.mxu1 %v3956_v17  ;;  %3430 = vmatpush3.bf16.msra.mxu0 %v4019_v22 }
 0x1eb   :  { %2757 = vmatprep.subr.bf16.mxu1 %v3961_v20  ;;  %3431 = vmatprep.subr.bf16.mxu0 %v4020_v18 }
 0x1ee   :  { %2758 = vmatpush1.bf16.msra.mxu1 %v3959_v23  ;;  %3432 = vmatpush3.bf16.msra.mxu0 %v4021_v25 }
 0x1f1   :  { %2760 = vmatmul.mubr.bf16.vlgmr.msra.gmra.mrb[4].mxu1 %v4387_v59  ;;  %2917 = vmatmul.mubr.bf16.vlgmr.msra.gmra.mrb[24].mxu0 %v2802_v24 }
 0x204   :  { %v2515_v32 = vpop.f32.mrb[0].mxu1 }
 0x205   :  { %v3439_v33 = vadd.f32 %v2515_v32, %v932_v30  ;;  %v2517_v34 = vpop.f32.mrb[1].mxu1 }
 0x206   :  { %v3440_v35 = vadd.f32 %v2517_v34, %v936_v31  ;;  %v2519_v36 = vpop.f32.mrb[2].mxu1 }
 0x207   :  { %3962 = vtanh.f32 %v3439_v33  ;;  %v2520_v59 = vpop.f32.mrb[3].mxu1 }
 0x208   :  { %3964 = vtanh.f32 %v3440_v35 }
 0x211   :  { %v3963_v37 = vpop.eup %3962 }
 0x212   :  { %v3965_v38 = vpop.eup %3964  ;;  %2774 = vst [vmem:[#allocation16] sm:$0xff] %v3963_v37 }
 0x213   :  { %2775 = vst [vmem:[#allocation16 + $0x8] sm:$0xff] %v3965_v38 }
 0x214   :  { %4165 = shalt.err (!%p4162_p10)
}
 0x215   :  { %s4166_s13 = scalar_lea.hbm %s4473_s6, 128 }
 0x216   :  { %p4167_p11 = scmp.ne.s32.totalorder %s4473_s6, %s4166_s13  ;;  %p4170_p12 = scmp.lt.u32.totalorder %s4166_s13, %s4473_s6 }
 0x218   :  { %p4172_p13 = pnand %p4170_p12, %p4167_p11 }
 0x21a   :  { %4175 = shalt.err (!%p4172_p13)
}
 0x21b   :  { %2934 = dma.vmem_to_hbm [thread:$0]  %s2932_s29, 128, %s4473_s6, [#allocation4]   ;;  %v939_v40 = vsub.s32 2, %v4414_v27  ;;  %v943_v41 = vsub.s32 3, %v4414_v27  ;;  %v947_v11 = vsub.s32 4, %v4414_v27  ;;  %v951_v1 = vsub.s32 5, %v4414_v27 }
 0x21c   :  { %s4243_s6 = smov [#allocation14]  }
 0x21d   :  { %v940_v42 = vrot.slane %v4417_v48, %v939_v40  ;;  %v944_v43 = vrot.slane %v4417_v48, %v943_v41  ;;  %v948_v2 = vrot.slane %v4417_v48, %v947_v11  ;;  %v952_v3 = vrot.slane %v4417_v48, %v951_v1  ;;  %s2941_s2 = sshll.u32 %s4243_s6, 4  ;;  %s2942_s2 = int_to_ptr.vmem [resolvable:$true] %s2941_s2 }
 0x21e   :  { %s4176_s11 = scalar_lea.vmem %s2942_s2, 128  ;;  %p4181_p1 = scmp.lt.s32.totalorder %s2942_s2, %s2942_s2 }
 0x21f   :  { %p4177_p0 = scmp.ne.s32.totalorder %s2942_s2, %s4176_s11  ;;  %p4182_p2 = scmp.lt.s32.totalorder %s4176_s11, %s4176_s11 }
 0x221   :  { %p4183_p3 = por %p4182_p2, %p4181_p1 }
 0x223   :  { %p4184_p4 = pnand %p4183_p3, %p4177_p0 }
 0x264   :  { %v2638_v45 = vpop.f32.mrb[12].mxu0 }
 0x265   :  { %v3441_v46 = vadd.f32 %v2638_v45, %v940_v42  ;;  %v2640_v47 = vpop.f32.mrb[13].mxu0 }
 0x266   :  { %v3442_v49 = vadd.f32 %v2640_v47, %v944_v43  ;;  %v2642_v50 = vpop.f32.mrb[14].mxu0 }
 0x267   :  { %3966 = vtanh.f32 %v3441_v46  ;;  %v2643_v51 = vpop.f32.mrb[15].mxu0 }
 0x268   :  { %3968 = vtanh.f32 %v3442_v49 }
 0x271   :  { %v3967_v52 = vpop.eup %3966 }
 0x272   :  { %v3969_v53 = vpop.eup %3968  ;;  %2776 = vst [vmem:[#allocation16 + $0x10] sm:$0xff] %v3967_v52 }
 0x273   :  { %2777 = vst [vmem:[#allocation16 + $0x18] sm:$0xff] %v3969_v53 }
 0x284   :  { %v3389_v54 = vpop.f32.mrb[16].mxu0 }
 0x285   :  { %v3390_v55 = vpop.f32.mrb[17].mxu0 }
 0x286   :  { %v3391_v39 = vadd.f32 %v3390_v55, %v3389_v54  ;;  %v3392_v56 = vpop.f32.mrb[18].mxu0 }
 0x287   :  { %v3393_v57 = vpop.f32.mrb[19].mxu0 }
 0x288   :  { %v2839_v44 = vadd.f32 %v3391_v39, %v4403_v5 }
 0x2a4   :  { %v3411_v58 = vpop.f32.mrb[20].mxu0 }
 0x2a5   :  { %v3412_v60 = vpop.f32.mrb[21].mxu0 }
 0x2a6   :  { %v3413_v61 = vadd.f32 %v3412_v60, %v3411_v58  ;;  %v3414_v62 = vpop.f32.mrb[22].mxu0 }
 0x2a7   :  { %v3415_v63 = vpop.f32.mrb[23].mxu0 }
 0x2a8   :  { %v2879_v0 = vadd.f32 %v3413_v61, %v2839_v44 }
 0x2c4   :  { %v2761_v4 = vpop.f32.mrb[4].mxu1  ;;  %v3433_v6 = vpop.f32.mrb[24].mxu0 }
 0x2c5   :  { %v3443_v7 = vadd.f32 %v2761_v4, %v948_v2  ;;  %v2763_v8 = vpop.f32.mrb[5].mxu1  ;;  %v3434_v9 = vpop.f32.mrb[25].mxu0 }
 0x2c6   :  { %v3444_v5 = vadd.f32 %v2763_v8, %v952_v3  ;;  %v3435_v10 = vadd.f32 %v3434_v9, %v3433_v6  ;;  %v2765_v12 = vpop.f32.mrb[6].mxu1  ;;  %v3436_v13 = vpop.f32.mrb[26].mxu0 }
 0x2c7   :  { %3970 = vtanh.f32 %v3443_v7  ;;  %v2766_v14 = vpop.f32.mrb[7].mxu1  ;;  %v3437_v15 = vpop.f32.mrb[27].mxu0 }
 0x2c8   :  { %3972 = vtanh.f32 %v3444_v5  ;;  %v2919_v16 = vadd.f32 %v3435_v10, %v2879_v0 }
 0x2ca   :  { %2924 = vst [vmem:[#allocation14] sm:$0xff] %v2919_v16 }
 0x2cb   :  { %4187 = shalt.err (!%p4184_p4)
}
 0x2cc   :  { %s4188_s20 = scalar_lea.hbm %s4474_s7, 128 }
 0x2cd   :  { %p4189_p5 = scmp.ne.s32.totalorder %s4474_s7, %s4188_s20  ;;  %p4192_p6 = scmp.lt.u32.totalorder %s4188_s20, %s4474_s7 }
 0x2cf   :  { %p4194_p7 = pnand %p4192_p6, %p4189_p5 }
 0x2d1   :  { %4197 = shalt.err (!%p4194_p7)
}
 0x2d2   :  { %2944 = dma.vmem_to_hbm [thread:$0]  %s2942_s2, 128, %s4474_s7, [#allocation15]   ;;  %v3971_v17 = vpop.eup %3970 }
 0x2d3   :  { %s4244_s27 = smov [#allocation16]   ;;  %v3973_v19 = vpop.eup %3972  ;;  %2778 = vst [vmem:[#allocation16 + $0x20] sm:$0xff] %v3971_v17 }
 0x2d4   :  { %s2951_s0 = sshll.u32 %s4244_s27, 4  ;;  %2779 = vst [vmem:[#allocation16 + $0x28] sm:$0xff] %v3973_v19  ;;  %s2952_s0 = int_to_ptr.vmem [resolvable:$true] %s2951_s0 }
 0x2d5   :  { %s4198_s1 = scalar_lea.vmem %s2952_s0, 768  ;;  %p4203_p9 = scmp.lt.s32.totalorder %s2952_s0, %s2952_s0 }
 0x2d6   :  { %p4199_p8 = scmp.ne.s32.totalorder %s2952_s0, %s4198_s1  ;;  %p4204_p10 = scmp.lt.s32.totalorder %s4198_s1, %s4198_s1 }
 0x2d8   :  { %p4205_p11 = por %p4204_p10, %p4203_p9 }
 0x2da   :  { %p4206_p12 = pnand %p4205_p11, %p4199_p8 }
 0x2dc   :  { %4209 = shalt.err (!%p4206_p12)
}
 0x2dd   :  { %s4210_s5 = scalar_lea.hbm %s4475_s8, 768 }
 0x2de   :  { %p4211_p13 = scmp.ne.s32.totalorder %s4475_s8, %s4210_s5  ;;  %p4214_p0 = scmp.lt.u32.totalorder %s4210_s5, %s4475_s8 }
 0x2e0   :  { %p4216_p1 = pnand %p4214_p0, %p4211_p13 }
 0x2e2   :  { %4219 = shalt.err (!%p4216_p1)
}
 0x2e3   :  { %2954 = dma.vmem_to_hbm [thread:$0]  %s2952_s0, 768, %s4475_s8, [#allocation15]  }
 0x2e4   :  { %4228 = dma.done.wait [#allocation4], 128  }
 0x2e5   :  { %4229 = vsyncadd [#allocation4], 4294967168 }
 0x2e6   :  { %4230 = dma.done.wait [#allocation15], 896  }
 0x2e7   :  { %4231 = vsyncadd [#allocation15], 4294966400 }
 0x2e8   :  { %2964 = vsyncpa [#allocation3], 1 }
 0x2e9   :  { %2965 = vsyncpa [#allocation6], 1 }
 0x2ea   :  { %2966 = vsyncpa [#allocation9], 1 }
 0x2eb   :  { %2967 = vsyncpa [#allocation12], 1 }
 0x2ec   :  { %2968 = vsyncpa [#allocation4], 1 }
 0x2ed   :  { %2969 = vsyncpa [#allocation15], 1 }

</bundles_post_ra>
